<compile_context>
chip_gen: v6e
topology: v6e:2x2x1
jax: 0.10.0
libtpu: 0.0.40
codegen_flags: <defaults>
</compile_context>

<pallas_src>
import functools

import jax
import jax.numpy as jnp
from jax import lax
from jax.experimental import pallas as pl
from jax.experimental.pallas import tpu as pltpu

_VMEM_LIMIT = 32 * 1024 * 1024  # safe on v5e/v6e (128 MiB) and v7x (64 MiB / TC)


# ------------------------- fused attention block kernel ------------------------
# out = x_q + Wo @ SDPA( RoPE(RMSNorm_q(x_q) @ Wq),
#                        RoPE(RMSNorm_k(x_kv) @ Wk),
#                        RMSNorm_k(x_kv) @ Wv )        (causal, GQA)
def _attn_block_kernel(xq_ref, xkv_ref, qs_ref, ks_ref,
                       wq_ref, wk_ref, wv_ref, wo_ref,
                       cos_ref, sin_ref, perm_ref, o_ref,
                       *, num_heads, num_kv_heads, head_dim, eps):
    S = xq_ref.shape[0]
    hd = head_dim
    q_per_kv = num_heads // num_kv_heads
    kv_w = num_kv_heads * hd

    xq = xq_ref[...].astype(jnp.float32)
    xkv = xkv_ref[...].astype(jnp.float32)

    def _rmsnorm(x, scale):
        ms = jnp.mean(x * x, axis=-1, keepdims=True)
        return x * lax.rsqrt(ms + eps) * scale

    nq = _rmsnorm(xq, qs_ref[...].astype(jnp.float32))
    nk = _rmsnorm(xkv, ks_ref[...].astype(jnp.float32))

    q = jnp.dot(nq, wq_ref[...], preferred_element_type=jnp.float32)  # [S, nh*hd]
    k = jnp.dot(nk, wk_ref[...], preferred_element_type=jnp.float32)  # [S, nkv*hd]
    v = jnp.dot(nk, wv_ref[...], preferred_element_type=jnp.float32)  # [S, nkv*hd]

    # Interleaved-pair RoPE:  rot(x) = x*cos + (x @ P)*sin   with P the
    # block-diagonal pair-swap-and-negate matrix (MXU work, no strided slices).
    cos = cos_ref[...]
    sin = sin_ref[...]
    perm = perm_ref[...]
    q = q * cos + jnp.dot(q, perm, preferred_element_type=jnp.float32) * sin
    k = (k * cos[:, :kv_w]
         + jnp.dot(k, perm[:kv_w, :kv_w],
                   preferred_element_type=jnp.float32) * sin[:, :kv_w])

    scale = 1.0 / float(hd) ** 0.5
    row = lax.broadcasted_iota(jnp.int32, (S, S), 0)
    col = lax.broadcasted_iota(jnp.int32, (S, S), 1)
    causal = col <= row

    # GQA: query head h reads kv head h // q_per_kv directly (never expanded).
    head_outs = []
    for h in range(num_heads):
        g = h // q_per_kv
        qh = q[:, h * hd:(h + 1) * hd]
        kh = k[:, g * hd:(g + 1) * hd]
        vh = v[:, g * hd:(g + 1) * hd]
        s = lax.dot_general(qh, kh, (((1,), (1,)), ((), ())),
                            preferred_element_type=jnp.float32) * scale
        s = jnp.where(causal, s, -1e30)
        p = jnp.exp(s - jnp.max(s, axis=-1, keepdims=True))
        p = p * pl.reciprocal(jnp.sum(p, axis=-1, keepdims=True), approx=False)
        head_outs.append(jnp.dot(p, vh, preferred_element_type=jnp.float32))
    attn = jnp.concatenate(head_outs, axis=-1)                        # [S, nh*hd]

    out = jnp.dot(attn, wo_ref[...], preferred_element_type=jnp.float32) + xq
    o_ref[...] = out.astype(o_ref.dtype)


def attention_block(xq, xkv, q_scale, k_scale, attn_p, rope, cfg):
    """Fused norm + QKV + RoPE + causal SDPA + out-proj + residual.  [B,S,D]->[B,S,D]."""
    B, S, D = xq.shape
    nh, nkv, hd = cfg["num_heads"], cfg["num_kv_heads"], cfg["head_dim"]
    qw, kw = nh * hd, nkv * hd
    cos = rope["cos"][:S]
    sin = rope["sin"][:S]
    perm = rope["perm"]

    kernel = functools.partial(_attn_block_kernel, num_heads=nh, num_kv_heads=nkv,
                               head_dim=hd, eps=cfg["norm_eps"])
    act = pl.BlockSpec((None, S, D), lambda b: (b, 0, 0))

    def rep(shape):  # replicated (weight / table) operand, single full block
        return pl.BlockSpec(shape, lambda b: (0,) * len(shape))

    return pl.pallas_call(
        kernel,
        out_shape=jax.ShapeDtypeStruct((B, S, D), xq.dtype),
        grid=(B,),
        in_specs=[act, act, rep((1, D)), rep((1, D)),
                  rep((D, qw)), rep((D, kw)), rep((D, kw)), rep((qw, D)),
                  rep((S, qw)), rep((S, qw)), rep((qw, qw))],
        out_specs=act,
        compiler_params=pltpu.CompilerParams(
            dimension_semantics=("parallel",),
            vmem_limit_bytes=_VMEM_LIMIT),
    )(xq, xkv, q_scale.reshape(1, D), k_scale.reshape(1, D),
      attn_p["wq"], attn_p["wk"], attn_p["wv"], attn_p["wo"], cos, sin, perm)


# ----------------------------- fused FFN block kernel ---------------------------
# out = x + Wd @ ( SiLU(gate) * up ),  [gate|up] = RMSNorm(x) @ [Wg|Wu]
def _ffn_block_kernel(x_ref, s_ref, wgu_ref, wd_ref, o_ref, *, hidden, eps):
    x = x_ref[...].astype(jnp.float32)
    ms = jnp.mean(x * x, axis=-1, keepdims=True)
    xn = x * lax.rsqrt(ms + eps) * s_ref[...].astype(jnp.float32)
    gu = jnp.dot(xn, wgu_ref[...], preferred_element_type=jnp.float32)  # [S, 2H]
    g = gu[:, :hidden]
    u = gu[:, hidden:]
    h = g * jax.nn.sigmoid(g) * u                                       # SiLU(g)*u
    o_ref[...] = (jnp.dot(h, wd_ref[...], preferred_element_type=jnp.float32)
                  + x).astype(o_ref.dtype)


def ffn_block(x, norm_scale, ff_p, cfg):
    """Fused RMSNorm + SwiGLU FFN + residual.  [B,S,D] -> [B,S,D]."""
    B, S, D = x.shape
    H2 = ff_p["w_gate_up"].shape[1]
    H = H2 // 2
    kernel = functools.partial(_ffn_block_kernel, hidden=H, eps=cfg["norm_eps"])
    act = pl.BlockSpec((None, S, D), lambda b: (b, 0, 0))
    return pl.pallas_call(
        kernel,
        out_shape=jax.ShapeDtypeStruct((B, S, D), x.dtype),
        grid=(B,),
        in_specs=[act,
                  pl.BlockSpec((1, D), lambda b: (0, 0)),
                  pl.BlockSpec((D, H2), lambda b: (0, 0)),
                  pl.BlockSpec((H, D), lambda b: (0, 0))],
        out_specs=act,
        compiler_params=pltpu.CompilerParams(
            dimension_semantics=("parallel",),
            vmem_limit_bytes=_VMEM_LIMIT),
    )(x, norm_scale.reshape(1, D), ff_p["w_gate_up"], ff_p["wd"])


# ---------------------------------- model blocks --------------------------------

def encoder_layer(p, x, rope, cfg):
    # residual = self_attn(self_norm(x), self_norm(x)) + x ; out = residual + ff(ff_norm(residual))
    h = attention_block(x, x, p["self_norm"], p["self_norm"], p["self_attn"], rope, cfg)
    return ffn_block(h, p["ff_norm"], p["ff"], cfg)


def decoder_layer(p, tgt, memory, rope, cfg):
    h = attention_block(tgt, tgt, p["self_norm"], p["self_norm"], p["self_attn"], rope, cfg)
    # NOTE: matching the PyTorch module, cross-attention also applies RoPE to the
    # memory-derived keys and runs with is_causal=True (kv_cache is None, mask is None).
    h = attention_block(h, memory, p["cross_q_norm"], p["cross_k_norm"],
                        p["cross_attn"], rope, cfg)
    return ffn_block(h, p["ff_norm"], p["ff"], cfg)


def transformer_forward(params, src, tgt, cfg):
    rope = params["rope"]
    memory, output = src, tgt
    for enc_p, dec_p in zip(params["encoder_layers"], params["decoder_layers"]):
        memory = encoder_layer(enc_p, memory, rope, cfg)
        output = decoder_layer(dec_p, output, memory, rope, cfg)
    return output


# --------------------------------- parameter init -------------------------------

def _init_linear(key, fan_in, fan_out):
    bound = 1.0 / (fan_in ** 0.5)
    # stored as [fan_in, fan_out] == PyTorch weight.T
    return jax.random.uniform(key, (fan_in, fan_out), jnp.float32, -bound, bound)


def _init_attn(key, cfg):
    D = cfg["dim"]
    nh, nkv, hd = cfg["num_heads"], cfg["num_kv_heads"], cfg["head_dim"]
    k1, k2, k3, k4 = jax.random.split(key, 4)
    return {"wq": _init_linear(k1, D, nh * hd),
            "wk": _init_linear(k2, D, nkv * hd),
            "wv": _init_linear(k3, D, nkv * hd),
            "wo": _init_linear(k4, nh * hd, D)}


def _init_ff(key, cfg):
    D, H = cfg["dim"], cfg["dim"] * cfg["dim_mult"]
    k1, k2, k3 = jax.random.split(key, 3)
    wg = _init_linear(k1, D, H)
    wd = _init_linear(k2, H, D)
    wu = _init_linear(k3, D, H)
    # gate|up concatenated -> one MXU matmul in the FFN kernel
    return {"w_gate_up": jnp.concatenate([wg, wu], axis=1), "wd": wd}


def make_rope(cfg):
    hd, nh = cfg["head_dim"], cfg["num_heads"]
    base, max_s = cfg["rope_theta_base"], cfg["max_seq_len"]
    theta = 1.0 / (base ** (jnp.arange(0, hd, 2, dtype=jnp.float32) / hd))
    pos = jnp.arange(max_s, dtype=jnp.float32)
    idx = jnp.outer(pos, theta)                                   # [max_s, hd//2]
    # per-pair repeat, then tiled per head -> width num_heads * head_dim
    cos = jnp.tile(jnp.repeat(jnp.cos(idx), 2, axis=-1), (1, nh))
    sin = jnp.tile(jnp.repeat(jnp.sin(idx), 2, axis=-1), (1, nh))
    w = nh * hd
    even = jnp.arange(0, w, 2)
    perm = jnp.zeros((w, w), jnp.float32)
    perm = perm.at[even, even + 1].set(1.0).at[even + 1, even].set(-1.0)
    return {"cos": cos, "sin": sin, "perm": perm}


def init_transformer(key, cfg):
    enc_layers, dec_layers = [], []
    ones = jnp.ones((cfg["dim"],), jnp.float32)
    for _ in range(cfg["depth"]):
        key, ka, kf = jax.random.split(key, 3)
        enc_layers.append({"self_attn": _init_attn(ka, cfg), "ff": _init_ff(kf, cfg),
                           "self_norm": ones, "ff_norm": ones})
        key, ksl, kcr, kf2 = jax.random.split(key, 4)
        dec_layers.append({"self_attn": _init_attn(ksl, cfg),
                           "cross_attn": _init_attn(kcr, cfg),
                           "ff": _init_ff(kf2, cfg),
                           "self_norm": ones, "cross_q_norm": ones,
                           "cross_k_norm": ones, "ff_norm": ones})
    return {"encoder_layers": enc_layers, "decoder_layers": dec_layers,
            "rope": make_rope(cfg)}


# -------------------------------------- main -------------------------------------

if __name__ == "__main__":
    cfg = dict(depth=2, dim=32, num_heads=4, num_kv_heads=2, head_dim=32 // 4,
               dim_mult=2, max_seq_len=128, rope_theta_base=10000, norm_eps=1e-5)

    key = jax.random.PRNGKey(0)
    kp, ksrc, ktgt = jax.random.split(key, 3)
    params = init_transformer(kp, cfg)

    B, S, D = 2, 8, cfg["dim"]
    src = jax.random.normal(ksrc, (B, S, D), jnp.float32)
    tgt = jax.random.normal(ktgt, (B, S, D), jnp.float32)

    fwd = jax.jit(functools.partial(transformer_forward, cfg=cfg))
    out = jax.block_until_ready(fwd(params, src, tgt))

    assert out.shape == (B, S, D), out.shape
    assert bool(jnp.all(jnp.isfinite(out)))
    print("KERNEL_OK")
</pallas_src>

<mosaic_0001>
module attributes {stable_mosaic.version = 11 : i64} {
  func.func @_attn_block_kernel(%arg0: i32, %arg1: memref<1x8x32xf32, #tpu.memory_space<vmem>>, %arg2: memref<1x8x32xf32, #tpu.memory_space<vmem>>, %arg3: memref<1x32xf32, #tpu.memory_space<vmem>>, %arg4: memref<1x32xf32, #tpu.memory_space<vmem>>, %arg5: memref<32x32xf32, #tpu.memory_space<vmem>>, %arg6: memref<32x16xf32, #tpu.memory_space<vmem>>, %arg7: memref<32x16xf32, #tpu.memory_space<vmem>>, %arg8: memref<32x32xf32, #tpu.memory_space<vmem>>, %arg9: memref<8x32xf32, #tpu.memory_space<vmem>>, %arg10: memref<8x32xf32, #tpu.memory_space<vmem>>, %arg11: memref<32x32xf32, #tpu.memory_space<vmem>>, %arg12: memref<1x8x32xf32, #tpu.memory_space<vmem>>) attributes {dimension_semantics = [#tpu.dimension_semantics<parallel>], iteration_bounds = array<i64: 2>, scalar_prefetch = 0 : i64, scratch_operands = 0 : i64, tpu.core_type = #tpu.core_type<tc>, window_params = [{transform_indices = @transform_0, window_bounds = array<i64: 1, 8, 32>}, {transform_indices = @transform_1, window_bounds = array<i64: 1, 8, 32>}, {pipeline_mode = #tpu.pipeline_mode<synchronous>, transform_indices = @transform_2, window_bounds = array<i64: 1, 32>}, {pipeline_mode = #tpu.pipeline_mode<synchronous>, transform_indices = @transform_3, window_bounds = array<i64: 1, 32>}, {pipeline_mode = #tpu.pipeline_mode<synchronous>, transform_indices = @transform_4, window_bounds = array<i64: 32, 32>}, {pipeline_mode = #tpu.pipeline_mode<synchronous>, transform_indices = @transform_5, window_bounds = array<i64: 32, 16>}, {pipeline_mode = #tpu.pipeline_mode<synchronous>, transform_indices = @transform_6, window_bounds = array<i64: 32, 16>}, {pipeline_mode = #tpu.pipeline_mode<synchronous>, transform_indices = @transform_7, window_bounds = array<i64: 32, 32>}, {pipeline_mode = #tpu.pipeline_mode<synchronous>, transform_indices = @transform_8, window_bounds = array<i64: 8, 32>}, {pipeline_mode = #tpu.pipeline_mode<synchronous>, transform_indices = @transform_9, window_bounds = array<i64: 8, 32>}, {pipeline_mode = #tpu.pipeline_mode<synchronous>, transform_indices = @transform_10, window_bounds = array<i64: 32, 32>}, {transform_indices = @transform_11, window_bounds = array<i64: 1, 8, 32>}]} {
    %c0 = arith.constant 0 : index
    %c0_0 = arith.constant 0 : index
    %c0_1 = arith.constant 0 : index
    %0 = vector.load %arg1[%c0, %c0_0, %c0_1] : memref<1x8x32xf32, #tpu.memory_space<vmem>>, vector<1x8x32xf32>
    %1 = vector.shape_cast %0 : vector<1x8x32xf32> to vector<8x32xf32>
    %c0_2 = arith.constant 0 : index
    %c0_3 = arith.constant 0 : index
    %c0_4 = arith.constant 0 : index
    %2 = vector.load %arg2[%c0_2, %c0_3, %c0_4] : memref<1x8x32xf32, #tpu.memory_space<vmem>>, vector<1x8x32xf32>
    %3 = vector.shape_cast %2 : vector<1x8x32xf32> to vector<8x32xf32>
    %c0_5 = arith.constant 0 : index
    %c0_6 = arith.constant 0 : index
    %4 = vector.load %arg3[%c0_5, %c0_6] : memref<1x32xf32, #tpu.memory_space<vmem>>, vector<1x32xf32>
    %5 = arith.mulf %1, %1 : vector<8x32xf32>
    %cst = arith.constant dense<0.000000e+00> : vector<8xf32>
    %6 = vector.multi_reduction <add>, %5, %cst [1] : vector<8x32xf32> to vector<8xf32>
    %7 = vector.shape_cast %6 : vector<8xf32> to vector<8x1xf32>
    %cst_7 = arith.constant 3.200000e+01 : f32
    %8 = vector.broadcast %cst_7 : f32 to vector<8x1xf32>
    %9 = arith.divf %7, %8 : vector<8x1xf32>
    %cst_8 = arith.constant 9.99999974E-6 : f32
    %10 = vector.broadcast %cst_8 : f32 to vector<8x1xf32>
    %11 = arith.addf %9, %10 : vector<8x1xf32>
    %12 = math.rsqrt %11 : vector<8x1xf32>
    %13 = vector.broadcast %12 : vector<8x1xf32> to vector<8x32xf32>
    %14 = arith.mulf %1, %13 : vector<8x32xf32>
    %15 = vector.broadcast %4 : vector<1x32xf32> to vector<8x32xf32>
    %16 = arith.mulf %14, %15 : vector<8x32xf32>
    %c0_9 = arith.constant 0 : index
    %c0_10 = arith.constant 0 : index
    %17 = vector.load %arg4[%c0_9, %c0_10] : memref<1x32xf32, #tpu.memory_space<vmem>>, vector<1x32xf32>
    %18 = arith.mulf %3, %3 : vector<8x32xf32>
    %cst_11 = arith.constant dense<0.000000e+00> : vector<8xf32>
    %19 = vector.multi_reduction <add>, %18, %cst_11 [1] : vector<8x32xf32> to vector<8xf32>
    %20 = vector.shape_cast %19 : vector<8xf32> to vector<8x1xf32>
    %cst_12 = arith.constant 3.200000e+01 : f32
    %21 = vector.broadcast %cst_12 : f32 to vector<8x1xf32>
    %22 = arith.divf %20, %21 : vector<8x1xf32>
    %cst_13 = arith.constant 9.99999974E-6 : f32
    %23 = vector.broadcast %cst_13 : f32 to vector<8x1xf32>
    %24 = arith.addf %22, %23 : vector<8x1xf32>
    %25 = math.rsqrt %24 : vector<8x1xf32>
    %26 = vector.broadcast %25 : vector<8x1xf32> to vector<8x32xf32>
    %27 = arith.mulf %3, %26 : vector<8x32xf32>
    %28 = vector.broadcast %17 : vector<1x32xf32> to vector<8x32xf32>
    %29 = arith.mulf %27, %28 : vector<8x32xf32>
    %c0_14 = arith.constant 0 : index
    %c0_15 = arith.constant 0 : index
    %30 = vector.load %arg5[%c0_14, %c0_15] : memref<32x32xf32, #tpu.memory_space<vmem>>, vector<32x32xf32>
    %cst_16 = arith.constant dense<0.000000e+00> : vector<8x32xf32>
    %31 = tpu.matmul %16, %30, %cst_16 {dimension_numbers = #tpu.dot_dimension_numbers<[1], [0], [0], [1], [0, 0, 1, 1], [], []>} : vector<8x32xf32>, vector<32x32xf32>, vector<8x32xf32> -> vector<8x32xf32>
    %c0_17 = arith.constant 0 : index
    %c0_18 = arith.constant 0 : index
    %32 = vector.load %arg6[%c0_17, %c0_18] : memref<32x16xf32, #tpu.memory_space<vmem>>, vector<32x16xf32>
    %cst_19 = arith.constant dense<0.000000e+00> : vector<8x16xf32>
    %33 = tpu.matmul %29, %32, %cst_19 {dimension_numbers = #tpu.dot_dimension_numbers<[1], [0], [0], [1], [0, 0, 1, 1], [], []>} : vector<8x32xf32>, vector<32x16xf32>, vector<8x16xf32> -> vector<8x16xf32>
    %c0_20 = arith.constant 0 : index
    %c0_21 = arith.constant 0 : index
    %34 = vector.load %arg7[%c0_20, %c0_21] : memref<32x16xf32, #tpu.memory_space<vmem>>, vector<32x16xf32>
    %cst_22 = arith.constant dense<0.000000e+00> : vector<8x16xf32>
    %35 = tpu.matmul %29, %34, %cst_22 {dimension_numbers = #tpu.dot_dimension_numbers<[1], [0], [0], [1], [0, 0, 1, 1], [], []>} : vector<8x32xf32>, vector<32x16xf32>, vector<8x16xf32> -> vector<8x16xf32>
    %c0_23 = arith.constant 0 : index
    %c0_24 = arith.constant 0 : index
    %36 = vector.load %arg9[%c0_23, %c0_24] : memref<8x32xf32, #tpu.memory_space<vmem>>, vector<8x32xf32>
    %c0_25 = arith.constant 0 : index
    %c0_26 = arith.constant 0 : index
    %37 = vector.load %arg10[%c0_25, %c0_26] : memref<8x32xf32, #tpu.memory_space<vmem>>, vector<8x32xf32>
    %c0_27 = arith.constant 0 : index
    %c0_28 = arith.constant 0 : index
    %38 = vector.load %arg11[%c0_27, %c0_28] : memref<32x32xf32, #tpu.memory_space<vmem>>, vector<32x32xf32>
    %39 = arith.mulf %31, %36 : vector<8x32xf32>
    %cst_29 = arith.constant dense<0.000000e+00> : vector<8x32xf32>
    %40 = tpu.matmul %31, %38, %cst_29 {dimension_numbers = #tpu.dot_dimension_numbers<[1], [0], [0], [1], [0, 0, 1, 1], [], []>} : vector<8x32xf32>, vector<32x32xf32>, vector<8x32xf32> -> vector<8x32xf32>
    %41 = arith.mulf %40, %37 : vector<8x32xf32>
    %42 = arith.addf %39, %41 : vector<8x32xf32>
    %43 = vector.extract_strided_slice %36 {offsets = [0, 0], sizes = [8, 16], strides = [1, 1]} : vector<8x32xf32> to vector<8x16xf32>
    %44 = arith.mulf %33, %43 : vector<8x16xf32>
    %45 = vector.extract_strided_slice %38 {offsets = [0, 0], sizes = [16, 16], strides = [1, 1]} : vector<32x32xf32> to vector<16x16xf32>
    %cst_30 = arith.constant dense<0.000000e+00> : vector<8x16xf32>
    %46 = tpu.matmul %33, %45, %cst_30 {dimension_numbers = #tpu.dot_dimension_numbers<[1], [0], [0], [1], [0, 0, 1, 1], [], []>} : vector<8x16xf32>, vector<16x16xf32>, vector<8x16xf32> -> vector<8x16xf32>
    %47 = vector.extract_strided_slice %37 {offsets = [0, 0], sizes = [8, 16], strides = [1, 1]} : vector<8x32xf32> to vector<8x16xf32>
    %48 = arith.mulf %46, %47 : vector<8x16xf32>
    %49 = arith.addf %44, %48 : vector<8x16xf32>
    %50 = tpu.iota {dimensions = array<i32: 0>} : vector<8x8xi32>
    %51 = tpu.iota {dimensions = array<i32: 1>} : vector<8x8xi32>
    %52 = arith.cmpi sle, %51, %50 : vector<8x8xi32>
    %53 = vector.extract_strided_slice %42 {offsets = [0, 0], sizes = [8, 8], strides = [1, 1]} : vector<8x32xf32> to vector<8x8xf32>
    %54 = vector.extract_strided_slice %49 {offsets = [0, 0], sizes = [8, 8], strides = [1, 1]} : vector<8x16xf32> to vector<8x8xf32>
    %55 = vector.extract_strided_slice %35 {offsets = [0, 0], sizes = [8, 8], strides = [1, 1]} : vector<8x16xf32> to vector<8x8xf32>
    %cst_31 = arith.constant dense<0.000000e+00> : vector<8x8xf32>
    %56 = tpu.matmul %53, %54, %cst_31 {dimension_numbers = #tpu.dot_dimension_numbers<[1], [1], [0], [0], [0, 0, 1, 0], [], []>} : vector<8x8xf32>, vector<8x8xf32>, vector<8x8xf32> -> vector<8x8xf32>
    %cst_32 = arith.constant 0.353553385 : f32
    %57 = vector.broadcast %cst_32 : f32 to vector<8x8xf32>
    %58 = arith.mulf %56, %57 : vector<8x8xf32>
    %cst_33 = arith.constant -1.000000e+30 : f32
    %59 = vector.broadcast %cst_33 : f32 to vector<8x8xf32>
    %60 = arith.select %52, %58, %59 : vector<8x8xi1>, vector<8x8xf32>
    %cst_34 = arith.constant dense<0xFF800000> : vector<8xf32>
    %61 = vector.multi_reduction <maximumf>, %60, %cst_34 [1] : vector<8x8xf32> to vector<8xf32>
    %62 = vector.shape_cast %61 : vector<8xf32> to vector<8x1xf32>
    %63 = vector.broadcast %62 : vector<8x1xf32> to vector<8x8xf32>
    %64 = arith.subf %60, %63 : vector<8x8xf32>
    %65 = math.exp %64 : vector<8x8xf32>
    %cst_35 = arith.constant dense<0.000000e+00> : vector<8xf32>
    %66 = vector.multi_reduction <add>, %65, %cst_35 [1] : vector<8x8xf32> to vector<8xf32>
    %67 = vector.shape_cast %66 : vector<8xf32> to vector<8x1xf32>
    %68 = tpu.reciprocal %67 : vector<8x1xf32> -> vector<8x1xf32>
    %69 = vector.broadcast %68 : vector<8x1xf32> to vector<8x8xf32>
    %70 = arith.mulf %65, %69 : vector<8x8xf32>
    %cst_36 = arith.constant dense<0.000000e+00> : vector<8x8xf32>
    %71 = tpu.matmul %70, %55, %cst_36 {dimension_numbers = #tpu.dot_dimension_numbers<[1], [0], [0], [1], [0, 0, 1, 1], [], []>} : vector<8x8xf32>, vector<8x8xf32>, vector<8x8xf32> -> vector<8x8xf32>
    %72 = vector.extract_strided_slice %42 {offsets = [0, 8], sizes = [8, 8], strides = [1, 1]} : vector<8x32xf32> to vector<8x8xf32>
    %73 = vector.extract_strided_slice %49 {offsets = [0, 0], sizes = [8, 8], strides = [1, 1]} : vector<8x16xf32> to vector<8x8xf32>
    %74 = vector.extract_strided_slice %35 {offsets = [0, 0], sizes = [8, 8], strides = [1, 1]} : vector<8x16xf32> to vector<8x8xf32>
    %cst_37 = arith.constant dense<0.000000e+00> : vector<8x8xf32>
    %75 = tpu.matmul %72, %73, %cst_37 {dimension_numbers = #tpu.dot_dimension_numbers<[1], [1], [0], [0], [0, 0, 1, 0], [], []>} : vector<8x8xf32>, vector<8x8xf32>, vector<8x8xf32> -> vector<8x8xf32>
    %cst_38 = arith.constant 0.353553385 : f32
    %76 = vector.broadcast %cst_38 : f32 to vector<8x8xf32>
    %77 = arith.mulf %75, %76 : vector<8x8xf32>
    %cst_39 = arith.constant -1.000000e+30 : f32
    %78 = vector.broadcast %cst_39 : f32 to vector<8x8xf32>
    %79 = arith.select %52, %77, %78 : vector<8x8xi1>, vector<8x8xf32>
    %cst_40 = arith.constant dense<0xFF800000> : vector<8xf32>
    %80 = vector.multi_reduction <maximumf>, %79, %cst_40 [1] : vector<8x8xf32> to vector<8xf32>
    %81 = vector.shape_cast %80 : vector<8xf32> to vector<8x1xf32>
    %82 = vector.broadcast %81 : vector<8x1xf32> to vector<8x8xf32>
    %83 = arith.subf %79, %82 : vector<8x8xf32>
    %84 = math.exp %83 : vector<8x8xf32>
    %cst_41 = arith.constant dense<0.000000e+00> : vector<8xf32>
    %85 = vector.multi_reduction <add>, %84, %cst_41 [1] : vector<8x8xf32> to vector<8xf32>
    %86 = vector.shape_cast %85 : vector<8xf32> to vector<8x1xf32>
    %87 = tpu.reciprocal %86 : vector<8x1xf32> -> vector<8x1xf32>
    %88 = vector.broadcast %87 : vector<8x1xf32> to vector<8x8xf32>
    %89 = arith.mulf %84, %88 : vector<8x8xf32>
    %cst_42 = arith.constant dense<0.000000e+00> : vector<8x8xf32>
    %90 = tpu.matmul %89, %74, %cst_42 {dimension_numbers = #tpu.dot_dimension_numbers<[1], [0], [0], [1], [0, 0, 1, 1], [], []>} : vector<8x8xf32>, vector<8x8xf32>, vector<8x8xf32> -> vector<8x8xf32>
    %91 = vector.extract_strided_slice %42 {offsets = [0, 16], sizes = [8, 8], strides = [1, 1]} : vector<8x32xf32> to vector<8x8xf32>
    %92 = vector.extract_strided_slice %49 {offsets = [0, 8], sizes = [8, 8], strides = [1, 1]} : vector<8x16xf32> to vector<8x8xf32>
    %93 = vector.extract_strided_slice %35 {offsets = [0, 8], sizes = [8, 8], strides = [1, 1]} : vector<8x16xf32> to vector<8x8xf32>
    %cst_43 = arith.constant dense<0.000000e+00> : vector<8x8xf32>
    %94 = tpu.matmul %91, %92, %cst_43 {dimension_numbers = #tpu.dot_dimension_numbers<[1], [1], [0], [0], [0, 0, 1, 0], [], []>} : vector<8x8xf32>, vector<8x8xf32>, vector<8x8xf32> -> vector<8x8xf32>
    %cst_44 = arith.constant 0.353553385 : f32
    %95 = vector.broadcast %cst_44 : f32 to vector<8x8xf32>
    %96 = arith.mulf %94, %95 : vector<8x8xf32>
    %cst_45 = arith.constant -1.000000e+30 : f32
    %97 = vector.broadcast %cst_45 : f32 to vector<8x8xf32>
    %98 = arith.select %52, %96, %97 : vector<8x8xi1>, vector<8x8xf32>
    %cst_46 = arith.constant dense<0xFF800000> : vector<8xf32>
    %99 = vector.multi_reduction <maximumf>, %98, %cst_46 [1] : vector<8x8xf32> to vector<8xf32>
    %100 = vector.shape_cast %99 : vector<8xf32> to vector<8x1xf32>
    %101 = vector.broadcast %100 : vector<8x1xf32> to vector<8x8xf32>
    %102 = arith.subf %98, %101 : vector<8x8xf32>
    %103 = math.exp %102 : vector<8x8xf32>
    %cst_47 = arith.constant dense<0.000000e+00> : vector<8xf32>
    %104 = vector.multi_reduction <add>, %103, %cst_47 [1] : vector<8x8xf32> to vector<8xf32>
    %105 = vector.shape_cast %104 : vector<8xf32> to vector<8x1xf32>
    %106 = tpu.reciprocal %105 : vector<8x1xf32> -> vector<8x1xf32>
    %107 = vector.broadcast %106 : vector<8x1xf32> to vector<8x8xf32>
    %108 = arith.mulf %103, %107 : vector<8x8xf32>
    %cst_48 = arith.constant dense<0.000000e+00> : vector<8x8xf32>
    %109 = tpu.matmul %108, %93, %cst_48 {dimension_numbers = #tpu.dot_dimension_numbers<[1], [0], [0], [1], [0, 0, 1, 1], [], []>} : vector<8x8xf32>, vector<8x8xf32>, vector<8x8xf32> -> vector<8x8xf32>
    %110 = vector.extract_strided_slice %42 {offsets = [0, 24], sizes = [8, 8], strides = [1, 1]} : vector<8x32xf32> to vector<8x8xf32>
    %111 = vector.extract_strided_slice %49 {offsets = [0, 8], sizes = [8, 8], strides = [1, 1]} : vector<8x16xf32> to vector<8x8xf32>
    %112 = vector.extract_strided_slice %35 {offsets = [0, 8], sizes = [8, 8], strides = [1, 1]} : vector<8x16xf32> to vector<8x8xf32>
    %cst_49 = arith.constant dense<0.000000e+00> : vector<8x8xf32>
    %113 = tpu.matmul %110, %111, %cst_49 {dimension_numbers = #tpu.dot_dimension_numbers<[1], [1], [0], [0], [0, 0, 1, 0], [], []>} : vector<8x8xf32>, vector<8x8xf32>, vector<8x8xf32> -> vector<8x8xf32>
    %cst_50 = arith.constant 0.353553385 : f32
    %114 = vector.broadcast %cst_50 : f32 to vector<8x8xf32>
    %115 = arith.mulf %113, %114 : vector<8x8xf32>
    %cst_51 = arith.constant -1.000000e+30 : f32
    %116 = vector.broadcast %cst_51 : f32 to vector<8x8xf32>
    %117 = arith.select %52, %115, %116 : vector<8x8xi1>, vector<8x8xf32>
    %cst_52 = arith.constant dense<0xFF800000> : vector<8xf32>
    %118 = vector.multi_reduction <maximumf>, %117, %cst_52 [1] : vector<8x8xf32> to vector<8xf32>
    %119 = vector.shape_cast %118 : vector<8xf32> to vector<8x1xf32>
    %120 = vector.broadcast %119 : vector<8x1xf32> to vector<8x8xf32>
    %121 = arith.subf %117, %120 : vector<8x8xf32>
    %122 = math.exp %121 : vector<8x8xf32>
    %cst_53 = arith.constant dense<0.000000e+00> : vector<8xf32>
    %123 = vector.multi_reduction <add>, %122, %cst_53 [1] : vector<8x8xf32> to vector<8xf32>
    %124 = vector.shape_cast %123 : vector<8xf32> to vector<8x1xf32>
    %125 = tpu.reciprocal %124 : vector<8x1xf32> -> vector<8x1xf32>
    %126 = vector.broadcast %125 : vector<8x1xf32> to vector<8x8xf32>
    %127 = arith.mulf %122, %126 : vector<8x8xf32>
    %cst_54 = arith.constant dense<0.000000e+00> : vector<8x8xf32>
    %128 = tpu.matmul %127, %112, %cst_54 {dimension_numbers = #tpu.dot_dimension_numbers<[1], [0], [0], [1], [0, 0, 1, 1], [], []>} : vector<8x8xf32>, vector<8x8xf32>, vector<8x8xf32> -> vector<8x8xf32>
    %129 = tpu.concatenate %71, %90, %109, %128 in 1 : vector<8x8xf32>, vector<8x8xf32>, vector<8x8xf32>, vector<8x8xf32> -> vector<8x32xf32>
    %c0_55 = arith.constant 0 : index
    %c0_56 = arith.constant 0 : index
    %130 = vector.load %arg8[%c0_55, %c0_56] : memref<32x32xf32, #tpu.memory_space<vmem>>, vector<32x32xf32>
    %cst_57 = arith.constant dense<0.000000e+00> : vector<8x32xf32>
    %131 = tpu.matmul %129, %130, %cst_57 {dimension_numbers = #tpu.dot_dimension_numbers<[1], [0], [0], [1], [0, 0, 1, 1], [], []>} : vector<8x32xf32>, vector<32x32xf32>, vector<8x32xf32> -> vector<8x32xf32>
    %132 = arith.addf %131, %1 : vector<8x32xf32>
    %c0_58 = arith.constant 0 : index
    %c0_59 = arith.constant 0 : index
    %c0_60 = arith.constant 0 : index
    %133 = vector.load %arg12[%c0_58, %c0_59, %c0_60] : memref<1x8x32xf32, #tpu.memory_space<vmem>>, vector<1x8x32xf32>
    %134 = vector.shape_cast %133 : vector<1x8x32xf32> to vector<8x32xf32>
    %135 = vector.shape_cast %132 : vector<8x32xf32> to vector<1x8x32xf32>
    tpu.vector_store %arg12[%c0_58, %c0_59, %c0_60], %135 {strides = array<i32>} : memref<1x8x32xf32, #tpu.memory_space<vmem>>, vector<1x8x32xf32>,
    return
  }
  func.func @transform_0(%arg0: i32) -> (i32, i32, i32) {
    %c0_i32 = arith.constant 0 : i32
    %c0_i32_0 = arith.constant 0 : i32
    %c0_i32_1 = arith.constant 0 : i32
    return %arg0, %c0_i32, %c0_i32_0 : i32, i32, i32
  }
  func.func @transform_1(%arg0: i32) -> (i32, i32, i32) {
    %c0_i32 = arith.constant 0 : i32
    %c0_i32_0 = arith.constant 0 : i32
    %c0_i32_1 = arith.constant 0 : i32
    return %arg0, %c0_i32, %c0_i32_0 : i32, i32, i32
  }
  func.func @transform_2(%arg0: i32) -> (i32, i32) {
    %c0_i32 = arith.constant 0 : i32
    %c0_i32_0 = arith.constant 0 : i32
    %c0_i32_1 = arith.constant 0 : i32
    return %c0_i32, %c0_i32_0 : i32, i32
  }
  func.func @transform_3(%arg0: i32) -> (i32, i32) {
    %c0_i32 = arith.constant 0 : i32
    %c0_i32_0 = arith.constant 0 : i32
    %c0_i32_1 = arith.constant 0 : i32
    return %c0_i32, %c0_i32_0 : i32, i32
  }
  func.func @transform_4(%arg0: i32) -> (i32, i32) {
    %c0_i32 = arith.constant 0 : i32
    %c0_i32_0 = arith.constant 0 : i32
    %c0_i32_1 = arith.constant 0 : i32
    return %c0_i32, %c0_i32_0 : i32, i32
  }
  func.func @transform_5(%arg0: i32) -> (i32, i32) {
    %c0_i32 = arith.constant 0 : i32
    %c0_i32_0 = arith.constant 0 : i32
    %c0_i32_1 = arith.constant 0 : i32
    return %c0_i32, %c0_i32_0 : i32, i32
  }
  func.func @transform_6(%arg0: i32) -> (i32, i32) {
    %c0_i32 = arith.constant 0 : i32
    %c0_i32_0 = arith.constant 0 : i32
    %c0_i32_1 = arith.constant 0 : i32
    return %c0_i32, %c0_i32_0 : i32, i32
  }
  func.func @transform_7(%arg0: i32) -> (i32, i32) {
    %c0_i32 = arith.constant 0 : i32
    %c0_i32_0 = arith.constant 0 : i32
    %c0_i32_1 = arith.constant 0 : i32
    return %c0_i32, %c0_i32_0 : i32, i32
  }
  func.func @transform_8(%arg0: i32) -> (i32, i32) {
    %c0_i32 = arith.constant 0 : i32
    %c0_i32_0 = arith.constant 0 : i32
    %c0_i32_1 = arith.constant 0 : i32
    return %c0_i32, %c0_i32_0 : i32, i32
  }
  func.func @transform_9(%arg0: i32) -> (i32, i32) {
    %c0_i32 = arith.constant 0 : i32
    %c0_i32_0 = arith.constant 0 : i32
    %c0_i32_1 = arith.constant 0 : i32
    return %c0_i32, %c0_i32_0 : i32, i32
  }
  func.func @transform_10(%arg0: i32) -> (i32, i32) {
    %c0_i32 = arith.constant 0 : i32
    %c0_i32_0 = arith.constant 0 : i32
    %c0_i32_1 = arith.constant 0 : i32
    return %c0_i32, %c0_i32_0 : i32, i32
  }
  func.func @transform_11(%arg0: i32) -> (i32, i32, i32) {
    %c0_i32 = arith.constant 0 : i32
    %c0_i32_0 = arith.constant 0 : i32
    %c0_i32_1 = arith.constant 0 : i32
    return %arg0, %c0_i32, %c0_i32_0 : i32, i32, i32
  }
}

module attributes {stable_mosaic.version = 11 : i64} {
  func.func @_ffn_block_kernel(%arg0: i32, %arg1: memref<1x8x32xf32, #tpu.memory_space<vmem>>, %arg2: memref<1x32xf32, #tpu.memory_space<vmem>>, %arg3: memref<32x128xf32, #tpu.memory_space<vmem>>, %arg4: memref<64x32xf32, #tpu.memory_space<vmem>>, %arg5: memref<1x8x32xf32, #tpu.memory_space<vmem>>) attributes {dimension_semantics = [#tpu.dimension_semantics<parallel>], iteration_bounds = array<i64: 2>, scalar_prefetch = 0 : i64, scratch_operands = 0 : i64, tpu.core_type = #tpu.core_type<tc>, window_params = [{transform_indices = @transform_0, window_bounds = array<i64: 1, 8, 32>}, {pipeline_mode = #tpu.pipeline_mode<synchronous>, transform_indices = @transform_1, window_bounds = array<i64: 1, 32>}, {pipeline_mode = #tpu.pipeline_mode<synchronous>, transform_indices = @transform_2, window_bounds = array<i64: 32, 128>}, {pipeline_mode = #tpu.pipeline_mode<synchronous>, transform_indices = @transform_3, window_bounds = array<i64: 64, 32>}, {transform_indices = @transform_4, window_bounds = array<i64: 1, 8, 32>}]} {
    %c0 = arith.constant 0 : index
    %c0_0 = arith.constant 0 : index
    %c0_1 = arith.constant 0 : index
    %0 = vector.load %arg1[%c0, %c0_0, %c0_1] : memref<1x8x32xf32, #tpu.memory_space<vmem>>, vector<1x8x32xf32>
    %1 = vector.shape_cast %0 : vector<1x8x32xf32> to vector<8x32xf32>
    %2 = arith.mulf %1, %1 : vector<8x32xf32>
    %cst = arith.constant dense<0.000000e+00> : vector<8xf32>
    %3 = vector.multi_reduction <add>, %2, %cst [1] : vector<8x32xf32> to vector<8xf32>
    %4 = vector.shape_cast %3 : vector<8xf32> to vector<8x1xf32>
    %cst_2 = arith.constant 3.200000e+01 : f32
    %5 = vector.broadcast %cst_2 : f32 to vector<8x1xf32>
    %6 = arith.divf %4, %5 : vector<8x1xf32>
    %cst_3 = arith.constant 9.99999974E-6 : f32
    %7 = vector.broadcast %cst_3 : f32 to vector<8x1xf32>
    %8 = arith.addf %6, %7 : vector<8x1xf32>
    %9 = math.rsqrt %8 : vector<8x1xf32>
    %10 = vector.broadcast %9 : vector<8x1xf32> to vector<8x32xf32>
    %11 = arith.mulf %1, %10 : vector<8x32xf32>
    %c0_4 = arith.constant 0 : index
    %c0_5 = arith.constant 0 : index
    %12 = vector.load %arg2[%c0_4, %c0_5] : memref<1x32xf32, #tpu.memory_space<vmem>>, vector<1x32xf32>
    %13 = vector.broadcast %12 : vector<1x32xf32> to vector<8x32xf32>
    %14 = arith.mulf %11, %13 : vector<8x32xf32>
    %c0_6 = arith.constant 0 : index
    %c0_7 = arith.constant 0 : index
    %15 = vector.load %arg3[%c0_6, %c0_7] : memref<32x128xf32, #tpu.memory_space<vmem>>, vector<32x128xf32>
    %cst_8 = arith.constant dense<0.000000e+00> : vector<8x128xf32>
    %16 = tpu.matmul %14, %15, %cst_8 {dimension_numbers = #tpu.dot_dimension_numbers<[1], [0], [0], [1], [0, 0, 1, 1], [], []>} : vector<8x32xf32>, vector<32x128xf32>, vector<8x128xf32> -> vector<8x128xf32>
    %17 = vector.extract_strided_slice %16 {offsets = [0, 0], sizes = [8, 64], strides = [1, 1]} : vector<8x128xf32> to vector<8x64xf32>
    %18 = vector.extract_strided_slice %16 {offsets = [0, 64], sizes = [8, 64], strides = [1, 1]} : vector<8x128xf32> to vector<8x64xf32>
    %19 = arith.negf %17 : vector<8x64xf32>
    %20 = math.exp %19 : vector<8x64xf32>
    %cst_9 = arith.constant 1.000000e+00 : f32
    %21 = vector.broadcast %cst_9 : f32 to vector<8x64xf32>
    %22 = arith.addf %21, %20 : vector<8x64xf32>
    %23 = arith.divf %21, %22 : vector<8x64xf32>
    %24 = arith.mulf %17, %23 : vector<8x64xf32>
    %25 = arith.mulf %24, %18 : vector<8x64xf32>
    %c0_10 = arith.constant 0 : index
    %c0_11 = arith.constant 0 : index
    %26 = vector.load %arg4[%c0_10, %c0_11] : memref<64x32xf32, #tpu.memory_space<vmem>>, vector<64x32xf32>
    %cst_12 = arith.constant dense<0.000000e+00> : vector<8x32xf32>
    %27 = tpu.matmul %25, %26, %cst_12 {dimension_numbers = #tpu.dot_dimension_numbers<[1], [0], [0], [1], [0, 0, 1, 1], [], []>} : vector<8x64xf32>, vector<64x32xf32>, vector<8x32xf32> -> vector<8x32xf32>
    %28 = arith.addf %27, %1 : vector<8x32xf32>
    %c0_13 = arith.constant 0 : index
    %c0_14 = arith.constant 0 : index
    %c0_15 = arith.constant 0 : index
    %29 = vector.load %arg5[%c0_13, %c0_14, %c0_15] : memref<1x8x32xf32, #tpu.memory_space<vmem>>, vector<1x8x32xf32>
    %30 = vector.shape_cast %29 : vector<1x8x32xf32> to vector<8x32xf32>
    %31 = vector.shape_cast %28 : vector<8x32xf32> to vector<1x8x32xf32>
    tpu.vector_store %arg5[%c0_13, %c0_14, %c0_15], %31 {strides = array<i32>} : memref<1x8x32xf32, #tpu.memory_space<vmem>>, vector<1x8x32xf32>,
    return
  }
  func.func @transform_0(%arg0: i32) -> (i32, i32, i32) {
    %c0_i32 = arith.constant 0 : i32
    %c0_i32_0 = arith.constant 0 : i32
    %c0_i32_1 = arith.constant 0 : i32
    return %arg0, %c0_i32, %c0_i32_0 : i32, i32, i32
  }
  func.func @transform_1(%arg0: i32) -> (i32, i32) {
    %c0_i32 = arith.constant 0 : i32
    %c0_i32_0 = arith.constant 0 : i32
    %c0_i32_1 = arith.constant 0 : i32
    return %c0_i32, %c0_i32_0 : i32, i32
  }
  func.func @transform_2(%arg0: i32) -> (i32, i32) {
    %c0_i32 = arith.constant 0 : i32
    %c0_i32_0 = arith.constant 0 : i32
    %c0_i32_1 = arith.constant 0 : i32
    return %c0_i32, %c0_i32_0 : i32, i32
  }
  func.func @transform_3(%arg0: i32) -> (i32, i32) {
    %c0_i32 = arith.constant 0 : i32
    %c0_i32_0 = arith.constant 0 : i32
    %c0_i32_1 = arith.constant 0 : i32
    return %c0_i32, %c0_i32_0 : i32, i32
  }
  func.func @transform_4(%arg0: i32) -> (i32, i32, i32) {
    %c0_i32 = arith.constant 0 : i32
    %c0_i32_0 = arith.constant 0 : i32
    %c0_i32_1 = arith.constant 0 : i32
    return %arg0, %c0_i32, %c0_i32_0 : i32, i32, i32
  }
}

module attributes {stable_mosaic.version = 11 : i64} {
  func.func @_ffn_block_kernel(%arg0: i32, %arg1: memref<1x8x32xf32, #tpu.memory_space<vmem>>, %arg2: memref<1x32xf32, #tpu.memory_space<vmem>>, %arg3: memref<32x128xf32, #tpu.memory_space<vmem>>, %arg4: memref<64x32xf32, #tpu.memory_space<vmem>>, %arg5: memref<1x8x32xf32, #tpu.memory_space<vmem>>) attributes {dimension_semantics = [#tpu.dimension_semantics<parallel>], iteration_bounds = array<i64: 2>, scalar_prefetch = 0 : i64, scratch_operands = 0 : i64, tpu.core_type = #tpu.core_type<tc>, window_params = [{transform_indices = @transform_0, window_bounds = array<i64: 1, 8, 32>}, {pipeline_mode = #tpu.pipeline_mode<synchronous>, transform_indices = @transform_1, window_bounds = array<i64: 1, 32>}, {pipeline_mode = #tpu.pipeline_mode<synchronous>, transform_indices = @transform_2, window_bounds = array<i64: 32, 128>}, {pipeline_mode = #tpu.pipeline_mode<synchronous>, transform_indices = @transform_3, window_bounds = array<i64: 64, 32>}, {transform_indices = @transform_4, window_bounds = array<i64: 1, 8, 32>}]} {
    %c0 = arith.constant 0 : index
    %c0_0 = arith.constant 0 : index
    %c0_1 = arith.constant 0 : index
    %0 = vector.load %arg1[%c0, %c0_0, %c0_1] : memref<1x8x32xf32, #tpu.memory_space<vmem>>, vector<1x8x32xf32>
    %1 = vector.shape_cast %0 : vector<1x8x32xf32> to vector<8x32xf32>
    %2 = arith.mulf %1, %1 : vector<8x32xf32>
    %cst = arith.constant dense<0.000000e+00> : vector<8xf32>
    %3 = vector.multi_reduction <add>, %2, %cst [1] : vector<8x32xf32> to vector<8xf32>
    %4 = vector.shape_cast %3 : vector<8xf32> to vector<8x1xf32>
    %cst_2 = arith.constant 3.200000e+01 : f32
    %5 = vector.broadcast %cst_2 : f32 to vector<8x1xf32>
    %6 = arith.divf %4, %5 : vector<8x1xf32>
    %cst_3 = arith.constant 9.99999974E-6 : f32
    %7 = vector.broadcast %cst_3 : f32 to vector<8x1xf32>
    %8 = arith.addf %6, %7 : vector<8x1xf32>
    %9 = math.rsqrt %8 : vector<8x1xf32>
    %10 = vector.broadcast %9 : vector<8x1xf32> to vector<8x32xf32>
    %11 = arith.mulf %1, %10 : vector<8x32xf32>
    %c0_4 = arith.constant 0 : index
    %c0_5 = arith.constant 0 : index
    %12 = vector.load %arg2[%c0_4, %c0_5] : memref<1x32xf32, #tpu.memory_space<vmem>>, vector<1x32xf32>
    %13 = vector.broadcast %12 : vector<1x32xf32> to vector<8x32xf32>
    %14 = arith.mulf %11, %13 : vector<8x32xf32>
    %c0_6 = arith.constant 0 : index
    %c0_7 = arith.constant 0 : index
    %15 = vector.load %arg3[%c0_6, %c0_7] : memref<32x128xf32, #tpu.memory_space<vmem>>, vector<32x128xf32>
    %cst_8 = arith.constant dense<0.000000e+00> : vector<8x128xf32>
    %16 = tpu.matmul %14, %15, %cst_8 {dimension_numbers = #tpu.dot_dimension_numbers<[1], [0], [0], [1], [0, 0, 1, 1], [], []>} : vector<8x32xf32>, vector<32x128xf32>, vector<8x128xf32> -> vector<8x128xf32>
    %17 = vector.extract_strided_slice %16 {offsets = [0, 0], sizes = [8, 64], strides = [1, 1]} : vector<8x128xf32> to vector<8x64xf32>
    %18 = vector.extract_strided_slice %16 {offsets = [0, 64], sizes = [8, 64], strides = [1, 1]} : vector<8x128xf32> to vector<8x64xf32>
    %19 = arith.negf %17 : vector<8x64xf32>
    %20 = math.exp %19 : vector<8x64xf32>
    %cst_9 = arith.constant 1.000000e+00 : f32
    %21 = vector.broadcast %cst_9 : f32 to vector<8x64xf32>
    %22 = arith.addf %21, %20 : vector<8x64xf32>
    %23 = arith.divf %21, %22 : vector<8x64xf32>
    %24 = arith.mulf %17, %23 : vector<8x64xf32>
    %25 = arith.mulf %24, %18 : vector<8x64xf32>
    %c0_10 = arith.constant 0 : index
    %c0_11 = arith.constant 0 : index
    %26 = vector.load %arg4[%c0_10, %c0_11] : memref<64x32xf32, #tpu.memory_space<vmem>>, vector<64x32xf32>
    %cst_12 = arith.constant dense<0.000000e+00> : vector<8x32xf32>
    %27 = tpu.matmul %25, %26, %cst_12 {dimension_numbers = #tpu.dot_dimension_numbers<[1], [0], [0], [1], [0, 0, 1, 1], [], []>} : vector<8x64xf32>, vector<64x32xf32>, vector<8x32xf32> -> vector<8x32xf32>
    %28 = arith.addf %27, %1 : vector<8x32xf32>
    %c0_13 = arith.constant 0 : index
    %c0_14 = arith.constant 0 : index
    %c0_15 = arith.constant 0 : index
    %29 = vector.load %arg5[%c0_13, %c0_14, %c0_15] : memref<1x8x32xf32, #tpu.memory_space<vmem>>, vector<1x8x32xf32>
    %30 = vector.shape_cast %29 : vector<1x8x32xf32> to vector<8x32xf32>
    %31 = vector.shape_cast %28 : vector<8x32xf32> to vector<1x8x32xf32>
    tpu.vector_store %arg5[%c0_13, %c0_14, %c0_15], %31 {strides = array<i32>} : memref<1x8x32xf32, #tpu.memory_space<vmem>>, vector<1x8x32xf32>,
    return
  }
  func.func @transform_0(%arg0: i32) -> (i32, i32, i32) {
    %c0_i32 = arith.constant 0 : i32
    %c0_i32_0 = arith.constant 0 : i32
    %c0_i32_1 = arith.constant 0 : i32
    return %arg0, %c0_i32, %c0_i32_0 : i32, i32, i32
  }
  func.func @transform_1(%arg0: i32) -> (i32, i32) {
    %c0_i32 = arith.constant 0 : i32
    %c0_i32_0 = arith.constant 0 : i32
    %c0_i32_1 = arith.constant 0 : i32
    return %c0_i32, %c0_i32_0 : i32, i32
  }
  func.func @transform_2(%arg0: i32) -> (i32, i32) {
    %c0_i32 = arith.constant 0 : i32
    %c0_i32_0 = arith.constant 0 : i32
    %c0_i32_1 = arith.constant 0 : i32
    return %c0_i32, %c0_i32_0 : i32, i32
  }
  func.func @transform_3(%arg0: i32) -> (i32, i32) {
    %c0_i32 = arith.constant 0 : i32
    %c0_i32_0 = arith.constant 0 : i32
    %c0_i32_1 = arith.constant 0 : i32
    return %c0_i32, %c0_i32_0 : i32, i32
  }
  func.func @transform_4(%arg0: i32) -> (i32, i32, i32) {
    %c0_i32 = arith.constant 0 : i32
    %c0_i32_0 = arith.constant 0 : i32
    %c0_i32_1 = arith.constant 0 : i32
    return %arg0, %c0_i32, %c0_i32_0 : i32, i32, i32
  }
}

</mosaic_0001>

<bundles_post_ra>
// kernel: transformer_forward.19
= control target key start
LH: loop header
LB: loop body
LE: loop exit
PB: predicated region body
PF: predicated region fallthrough
CT: control target
= control target key end

     0   :  { %9 = vsyncpa [#allocation3], 0  ;;  %s795_s0 = inlined_call_operand.vmem [shape: f32[2,8,32], index: 0, kind: input, shape index: {}]   ;;  %s796_s1 = inlined_call_operand.vmem [shape: f32[1,32], index: 1, kind: input, shape index: {}]   ;;  %s797_s2 = inlined_call_operand.vmem [shape: f32[32,128], index: 2, kind: input, shape index: {}]   ;;  %s798_s3 = inlined_call_operand.vmem [shape: f32[64,32], index: 3, kind: input, shape index: {}]   ;;  %s799_s4 = inlined_call_operand.hbm [shape: f32[2,8,32], index: 4, kind: output, shape index: {}]  }
   0x1   :  { %11 = vsyncpa [#allocation3 + $0x1], 0  ;;  %s654_s15 = smov 0   ;;  %s656_s16 = smov 0  }
   0x2   :  { %s658_s17 = smov 0   ;;  %s660_s18 = smov 0  }
   0x3 LB: > { %s675_s19 = sadd.s32 4294967295, %s623_s18   ;;  %s457_s20 = sadd.s32 4294967294, %s623_s18   ;;  %s623_s18 = sphi %s660_s18, %s805_s18   ;;  %s619_s17 = sphi %s658_s17, %s804_s17   ;;  %s615_s16 = sphi %s656_s16, %s803_s16   ;;  %s611_s15 = sphi %s654_s15, %s802_s15  }
   0x4   : > { %s679_s21 = sadd.s32 1, %s623_s18   ;;  %s113_s22 = sadd.s32 1, %s619_s17 }
   0x5   : > { %s110_s23 = ssub.s32 %s623_s18, %s679_s21  ;;  %p123_p0 = scmp.ne.s32.totalorder %s619_s17, %s615_s16 }
   0x6   : > { %p111_p1 = scmp.eq.s32.totalorder %s110_s23, 0  ;;  %p124_p2 = scmp.eq.s32.totalorder %s675_s19, 1 }
   0x7   : > { %p129_p3 = scmp.ne.s32.totalorder %s615_s16, %s611_s15  ;;  %p130_p4 = scmp.eq.s32.totalorder %s457_s20, 1 }
   0x8   : > { %s690_s24 = scalar_select %p111_p1, %s619_s17, %s113_s22  }
   0x9   : > { %p692_p5 = por %p124_p2, %p123_p0  ;;  %p696_p6 = por %p130_p4, %p129_p3 }
   0xa   : > { %p460_p7 = scmp.ge.s32.totalorder %s623_s18, 1  ;;  %p164_p8 = scmp.lt.s32.totalorder %s623_s18, 3 }
   0xc   : > { %p165_p9 = pnand %p460_p7, %p164_p8 }
   0xd   : > { %p189_p10 = scmp.lt.s32.totalorder (!%p165_p9), %s675_s19, 1  ;;  %s627_s20 = smov (!%p165_p9), 64  }
   0xe   : > { %168 = sbr.rel (%p165_p9) target bundleno = 705 (0x2c1), region = 36  ;;  %s186_s22 = sand.u32 (!%p165_p9), 1, %s615_s16  }
   0xf   : > { %s461_s23 = sshll.u32 (!%p165_p9), %s186_s22, 3  ;;  %s385_s7 = scalar_lea.sflag (!%p165_p9), [#allocation3], %s186_s22 }
  0x13   : > { %s190_s27 = scalar_select %p189_p10, %s675_s19, 1  ;;  %vm195_vm0 = vcmask 261120   ;;  %v215_v3 = vld [vmem:[%s797_s2 + $0x18] sm:$0xff]  ;;  %v625_v4 = vmov 0.0   ;;  %v214_v5 = vld [vmem:[%s797_s2 + $0x10] sm:$0xff]  ;;  %vm626_vm1 = vmmov 0  }
  0x14   : > { %485 = vmatprep.subr.mxu0 %v625_v4  ;;  %493 = vmatprep.mubr.msk.f32.mxu0 %vm626_vm1, %v625_v4  ;;  %v213_v6 = vld [vmem:[%s797_s2 + $0x8] sm:$0xff]  ;;  %v212_v7 = vld [vmem:[%s797_s2] sm:$0xff]  ;;  %v308_v15 = vld [vmem:[%s798_s3 + $0x38] sm:$0xff]  ;;  %vm309_vm2 = vcmask 523264  }
  0x15   : > { %s462_s28 = sshll.u32 %s190_s27, 3  ;;  %486 = vmatpush3.msra.mxu0 %v215_v3  ;;  %496 = vmatprep.subr.mxu1 %v625_v4  ;;  %v463_v12 = vld [vmem:[%s796_s1] ss:$0 sm:$0xff]  ;;  %v307_v16 = vld [vmem:[%s798_s3 + $0x30] sm:$0xff]  ;;  %v306_v17 = vld [vmem:[%s798_s3 + $0x28] sm:$0xff]  ;;  %s468_s27 = sshll.u32 %s675_s19, 7 }
  0x16   : > { %s192_s5 = scalar_lea.vmem %s795_s0, %s462_s28  ;;  %487 = vmatprep.subr.mxu0 %v625_v4  ;;  %512 = vmatprep.mubr.msk.f32.mxu1 %vm626_vm1, %v625_v4  ;;  %v305_v18 = vld [vmem:[%s798_s3 + $0x20] sm:$0xff]  ;;  %v304_v19 = vld [vmem:[%s798_s3 + $0x18] sm:$0xff]  ;;  %v303_v20 = vld [vmem:[%s798_s3 + $0x10] sm:$0xff]  ;;  %s188_s28 = scalar_lea.vmem [#allocation2], %s461_s23 }
  0x17   : > { %v707_v0 = vld [vmem:[%s192_s5] sm:$0xff]  ;;  %488 = vmatpush3.msra.mxu0 %v214_v5  ;;  %497 = vmatpush3.msra.mxu1 %v308_v15  ;;  %v302_v21 = vld [vmem:[%s798_s3 + $0x8] sm:$0xff]  ;;  %s398_s29 = sshll.u32 %s188_s28, 4  ;;  %s759_s6 = scalar_lea.hbm %s799_s4, %s468_s27  ;;  %s399_s29 = int_to_ptr.vmem [resolvable:$true] %s398_s29 }
  0x18   : > { %v194_v1 = vmul.f32 %v707_v0, %v707_v0  ;;  %489 = vmatprep.subr.mxu0 %v625_v4  ;;  %498 = vmatprep.subr.mxu1 %v625_v4  ;;  %v301_v22 = vld [vmem:[%s798_s3] sm:$0xff]  ;;  %s563_s8 = scalar_lea.vmem %s399_s29, 128  ;;  %s628_s19 = smov [#allocation2]  }
  0x19   : > { %490 = vmatpush3.msra.mxu0 %v213_v6  ;;  %499 = vmatpush3.msra.mxu1 %v307_v16  ;;  %p564_p11 = scmp.ne.s32.totalorder %s399_s29, %s563_s8  ;;  %s567_s9 = sshll.u32 %s628_s19, 4  ;;  %s568_s9 = int_to_ptr.vmem [resolvable:$false] %s567_s9 }
  0x1a   : > { %v196_v2 = vsel %vm195_vm0, %v194_v1, 0.0  ;;  %491 = vmatprep.subr.mxu0 %v625_v4  ;;  %500 = vmatprep.subr.mxu1 %v625_v4  ;;  %s569_s10 = scalar_lea.vmem %s568_s9, 256  ;;  %p570_p0 = scmp.lt.s32.totalorder %s399_s29, %s568_s9 }
  0x1b   : > { %197 = vadd.xlane.f32.xlu0 %v196_v2  ;;  %492 = vmatpush3.msra.mxu0 %v212_v7  ;;  %p565_p12 = pnand %p564_p11, %p692_p5  ;;  %p571_p1 = scmp.lt.s32.totalorder %s569_s10, %s563_s8 }
  0x1c   : > { %501 = vmatpush3.msra.mxu1 %v306_v17 }
  0x1d   : > { %502 = vmatprep.subr.mxu1 %v625_v4  ;;  %p566_p13 = pneg %p565_p12  ;;  %p572_p2 = por %p571_p1, %p570_p0 }
  0x1e   : > { %503 = vmatpush3.msra.mxu1 %v305_v18 }
  0x1f   : > { %504 = vmatprep.subr.mxu1 %v625_v4  ;;  %p573_p3 = pnand %p572_p2, %p566_p13 }
  0x20   : > { %505 = vmatpush3.msra.mxu1 %v304_v19 }
  0x21   : > { %506 = vmatprep.subr.mxu1 %v625_v4 }
  0x22   : > { %507 = vmatpush3.msra.mxu1 %v303_v20 }
  0x23   : > { %508 = vmatprep.subr.mxu1 %v625_v4 }
  0x24   : > { %509 = vmatpush3.msra.mxu1 %v302_v21 }
  0x25   : > { %510 = vmatprep.subr.mxu1 %v625_v4 }
  0x26   : > { %511 = vmatpush3.msra.mxu1 %v301_v22 }
  0xa4   : > { %v198_v8 = vpop.xlane.xlu0 %197 }
  0xa5   : > { %v200_v9 = vmul.f32 0.03125, %v198_v8 }
  0xa7   : > { %v201_v10 = vadd.f32 1e-05, %v200_v9 }
  0xa9   : > { %557 = vrsqrt.f32 %v201_v10 }
  0xb6   : > { %v558_v11 = vpop.eup %557 }
  0xb7   : > { %v203_v13 = vmul.f32 %v558_v11, %v707_v0 }
  0xb9   : > { %v211_v14 = vmul.f32 %v463_v12, %v203_v13 }
  0xbb   : > { %494 = vmatmul.mubr.msk.f32.vlgmr.msra.gmra.mxu0 %vm195_vm0, %v211_v14 }
 0x17b   : > { %v285_v23 = vpop.f32.mrf.mxu0 }
 0x17c   : > { %297 = vrot.lane.b32.xlu0 %v285_v23, %s627_s20  ;;  %v465_v25 = vmul.f32 -1.442695, %v285_v23 }
 0x17d   : > { %v495_v24 = vpop.f32.mrf.mxu0 }
 0x17e   : > { %559 = vpow2.f32 %v465_v25 }
 0x18b   : > { %v560_v26 = vpop.eup %559 }
 0x18c   : > { %v292_v27 = vadd.f32 1.0, %v560_v26 }
 0x18e   : > { %561 = vrcp.f32 %v292_v27 }
 0x19b   : > { %v562_v28 = vpop.eup %561 }
 0x19c   : > { %v295_v29 = vmul.f32 %v562_v28, %v285_v23 }
 0x1ee   : > { %v298_v30 = vpop.permute.xlu0 %297 }
 0x1ef   : > { %v300_v31 = vmul.f32 %v298_v30, %v295_v29 }
 0x1f1   : > { %513 = vmatmul.mubr.msk.f32.vlgmr.msra.gmra.mxu1 %vm309_vm2, %v300_v31 }
 0x2b1   : > { %v379_v32 = vpop.f32.mrf.mxu1 }
 0x2b2   : > { %v380_v33 = vadd.f32 %v379_v32, %v707_v0 }
 0x2b3   : > { %v514_v34 = vpop.f32.mrf.mxu1 }
 0x2b4   : > { %383 = vst.msk [vmem:[%s188_s28] sm:$0xff] %vm195_vm0, %v380_v33 }
 0x2b5   : > { %576 = shalt.err (!%p573_p3)
}
 0x2b6   : > { %s577_s11 = scalar_lea.hbm %s759_s6, 128  ;;  %s581_s14 = scalar_lea.hbm %s799_s4, 256 }
 0x2b7   : > { %p578_p4 = scmp.ne.s32.totalorder %s759_s6, %s577_s11  ;;  %p582_p9 = scmp.lt.s32.totalorder %s759_s6, %s799_s4 }
 0x2b8   : > { %p583_p10 = scmp.lt.s32.totalorder %s581_s14, %s577_s11 }
 0x2b9   : > { %p579_p7 = pnand %p578_p4, %p692_p5 }
 0x2ba   : > { %p584_p11 = por %p583_p10, %p582_p9 }
 0x2bb   : > { %p580_p8 = pneg %p579_p7 }
 0x2bd   : > { %p585_p12 = pnand %p584_p11, %p580_p8 }
 0x2bf   : > { %588 = shalt.err (!%p585_p12)
}
 0x2c0   : > { %515 = dma.vmem_to_hbm [thread:$0]  (%p692_p5), %s399_s29, 128, %s759_s6, %s385_s7  }
 0x2c1 PF: > { %p521_p13 = scmp.ge.s32.totalorder %s623_s18, 2  ;;  %s410_s23 = sand.u32 1, %s611_s15  }
 0x2c2   : > { %s411_s27 = scalar_lea.sflag [#allocation3], %s410_s23 }
 0x2c3   : > { %p518_p0 = pnand %p521_p13, %p696_p6 }
 0x2c5   : > { %p519_p1 = pneg %p518_p0 }
 0x2c7   : > { %606 = dma.done.wait (%p519_p1), %s411_s27, 128  }
 0x2c8   : > { %608 = vsyncadd (%p519_p1), %s411_s27, 4294967168  ;;  %p14_p2 = scmp.ge.s32.totalorder %s679_s21, 4   ;;  %s802_s15 = smov %s615_s16 }
 0x2c9   : > { %s803_s16 = smov %s619_s17  ;;  %s804_s17 = smov %s690_s24 }
 0x2ca   : > { %s805_s18 = smov %s679_s21  ;;  %16 = sbr.rel (!%p14_p2) target bundleno = 3 (0x3), region = 71 }
 0x2cf   :  { %416 = vsyncpa [#allocation3], 1 }
 0x2d0   :  { %418 = vsyncpa [#allocation3 + $0x1], 1 }

// kernel: transformer_forward.11
= control target key start
LH: loop header
LB: loop body
LE: loop exit
PB: predicated region body
PF: predicated region fallthrough
CT: control target
= control target key end

     0   :  { %s547_s15 = smov 0   ;;  %s619_s0 = inlined_call_operand.vmem [shape: f32[2,8,32], index: 0, kind: input, shape index: {}]   ;;  %s620_s1 = inlined_call_operand.vmem [shape: f32[1,32], index: 1, kind: input, shape index: {}]   ;;  %s621_s2 = inlined_call_operand.vmem [shape: f32[32,128], index: 2, kind: input, shape index: {}]   ;;  %s622_s3 = inlined_call_operand.vmem [shape: f32[64,32], index: 3, kind: input, shape index: {}]   ;;  %s623_s4 = inlined_call_operand.vmem [shape: f32[2,8,32], index: 4, kind: output, shape index: {}]  }
   0x1 LB: > { %s437_s16 = sadd.s32 4294967295, %s517_s15   ;;  %p441_p0 = scmp.ge.s32.totalorder %s517_s15, 1  ;;  %s517_s15 = sphi %s547_s15, %s14_s15  }
   0x2   : > { %p161_p1 = scmp.lt.s32.totalorder %s517_s15, 3 }
   0x4   : > { %p162_p2 = pnand %p441_p0, %p161_p1 }
   0x5   : > { %p185_p3 = scmp.lt.s32.totalorder (!%p162_p2), %s437_s16, 1  ;;  %s521_s24 = smov (!%p162_p2), 64  }
   0x6   : > { %165 = sbr.rel (%p162_p2) target bundleno = 684 (0x2ac), region = 36 }
   0xb   : > { %s625_s16 = smov (!%p185_p3, %s437_s16), 1  ;;  %vm195_vm0 = vcmask 261120   ;;  %v215_v3 = vld [vmem:[%s621_s2 + $0x18] sm:$0xff]  ;;  %v519_v4 = vmov 0.0   ;;  %v214_v5 = vld [vmem:[%s621_s2 + $0x10] sm:$0xff]  ;;  %vm520_vm1 = vmmov 0  }
   0xc   : > { %s442_s17 = sshll.u32 %s625_s16, 3  ;;  %464 = vmatprep.subr.mxu0 %v519_v4  ;;  %472 = vmatprep.mubr.msk.f32.mxu0 %vm520_vm1, %v519_v4  ;;  %v213_v6 = vld [vmem:[%s621_s2 + $0x8] sm:$0xff]  ;;  %v212_v7 = vld [vmem:[%s621_s2] sm:$0xff]  ;;  %v308_v15 = vld [vmem:[%s622_s3 + $0x38] sm:$0xff]  ;;  %vm309_vm2 = vcmask 523264  }
   0xd   : > { %s188_s20 = scalar_lea.vmem %s619_s0, %s442_s17  ;;  %465 = vmatpush3.msra.mxu0 %v215_v3  ;;  %475 = vmatprep.subr.mxu1 %v519_v4  ;;  %v444_v12 = vld [vmem:[%s620_s1] ss:$0 sm:$0xff]  ;;  %v307_v16 = vld [vmem:[%s622_s3 + $0x30] sm:$0xff]  ;;  %v306_v17 = vld [vmem:[%s622_s3 + $0x28] sm:$0xff]  ;;  %s192_s27 = scalar_lea.vmem %s623_s4, %s442_s17 }
   0xe   : > { %v563_v0 = vld [vmem:[%s188_s20] sm:$0xff]  ;;  %466 = vmatprep.subr.mxu0 %v519_v4  ;;  %491 = vmatprep.mubr.msk.f32.mxu1 %vm520_vm1, %v519_v4  ;;  %v304_v19 = vld [vmem:[%s622_s3 + $0x18] sm:$0xff]  ;;  %v303_v20 = vld [vmem:[%s622_s3 + $0x10] sm:$0xff] }
   0xf   : > { %v194_v1 = vmul.f32 %v563_v0, %v563_v0  ;;  %467 = vmatpush3.msra.mxu0 %v214_v5  ;;  %476 = vmatpush3.msra.mxu1 %v308_v15  ;;  %v305_v18 = vld [vmem:[%s622_s3 + $0x20] sm:$0xff]  ;;  %v302_v21 = vld [vmem:[%s622_s3 + $0x8] sm:$0xff] }
  0x10   : > { %468 = vmatprep.subr.mxu0 %v519_v4  ;;  %477 = vmatprep.subr.mxu1 %v519_v4  ;;  %v301_v22 = vld [vmem:[%s622_s3] sm:$0xff] }
  0x11   : > { %v196_v2 = vsel %vm195_vm0, %v194_v1, 0.0  ;;  %469 = vmatpush3.msra.mxu0 %v213_v6  ;;  %478 = vmatpush3.msra.mxu1 %v307_v16 }
  0x12   : > { %197 = vadd.xlane.f32.xlu0 %v196_v2  ;;  %470 = vmatprep.subr.mxu0 %v519_v4 }
  0x13   : > { %471 = vmatpush3.msra.mxu0 %v212_v7  ;;  %479 = vmatprep.subr.mxu1 %v519_v4 }
  0x14   : > { %480 = vmatpush3.msra.mxu1 %v306_v17 }
  0x15   : > { %481 = vmatprep.subr.mxu1 %v519_v4 }
  0x16   : > { %482 = vmatpush3.msra.mxu1 %v305_v18 }
  0x17   : > { %483 = vmatprep.subr.mxu1 %v519_v4 }
  0x18   : > { %484 = vmatpush3.msra.mxu1 %v304_v19 }
  0x19   : > { %485 = vmatprep.subr.mxu1 %v519_v4 }
  0x1a   : > { %486 = vmatpush3.msra.mxu1 %v303_v20 }
  0x1b   : > { %487 = vmatprep.subr.mxu1 %v519_v4 }
  0x1c   : > { %488 = vmatpush3.msra.mxu1 %v302_v21 }
  0x1d   : > { %489 = vmatprep.subr.mxu1 %v519_v4 }
  0x1e   : > { %490 = vmatpush3.msra.mxu1 %v301_v22 }
  0x9b   : > { %v198_v8 = vpop.xlane.xlu0 %197 }
  0x9c   : > { %v200_v9 = vmul.f32 0.03125, %v198_v8 }
  0x9e   : > { %v201_v10 = vadd.f32 1e-05, %v200_v9 }
  0xa0   : > { %505 = vrsqrt.f32 %v201_v10 }
  0xad   : > { %v506_v11 = vpop.eup %505 }
  0xae   : > { %v203_v13 = vmul.f32 %v506_v11, %v563_v0 }
  0xb0   : > { %v211_v14 = vmul.f32 %v444_v12, %v203_v13 }
  0xb2   : > { %473 = vmatmul.mubr.msk.f32.vlgmr.msra.gmra.mxu0 %vm195_vm0, %v211_v14 }
 0x172   : > { %v285_v23 = vpop.f32.mrf.mxu0 }
 0x173   : > { %297 = vrot.lane.b32.xlu0 %v285_v23, %s521_s24  ;;  %v446_v25 = vmul.f32 -1.442695, %v285_v23 }
 0x174   : > { %v474_v24 = vpop.f32.mrf.mxu0 }
 0x175   : > { %507 = vpow2.f32 %v446_v25 }
 0x182   : > { %v508_v26 = vpop.eup %507 }
 0x183   : > { %v292_v27 = vadd.f32 1.0, %v508_v26 }
 0x185   : > { %509 = vrcp.f32 %v292_v27 }
 0x192   : > { %v510_v28 = vpop.eup %509 }
 0x193   : > { %v295_v29 = vmul.f32 %v510_v28, %v285_v23 }
 0x1e5   : > { %v298_v30 = vpop.permute.xlu0 %297 }
 0x1e6   : > { %v300_v31 = vmul.f32 %v298_v30, %v295_v29 }
 0x1e8   : > { %492 = vmatmul.mubr.msk.f32.vlgmr.msra.gmra.mxu1 %vm309_vm2, %v300_v31 }
 0x2a8   : > { %v379_v32 = vpop.f32.mrf.mxu1 }
 0x2a9   : > { %v380_v33 = vadd.f32 %v379_v32, %v563_v0 }
 0x2aa   : > { %v493_v34 = vpop.f32.mrf.mxu1 }
 0x2ab   : > { %383 = vst.msk [vmem:[%s192_s27] sm:$0xff] %vm195_vm0, %v380_v33 }
 0x2ac PF: > { %s14_s15 = sadd.s32 1, %s517_s15  }
 0x2ad   : > { %p11_p4 = scmp.ge.s32.totalorder %s14_s15, 4  }
 0x2af   :  { %13 = sbr.rel (!%p11_p4) target bundleno = 1 (0x1), region = 66 }

// kernel: transformer_forward.10
= control target key start
LH: loop header
LB: loop body
LE: loop exit
PB: predicated region body
PF: predicated region fallthrough
CT: control target
= control target key end

     0   :  { %s1925_s17 = smov 0   ;;  %s2129_s0 = inlined_call_operand.vmem [shape: f32[2,8,32], index: 0, kind: input, shape index: {}, may-alias: {0,1}]   ;;  %s2130_s1 = inlined_call_operand.vmem [shape: f32[2,8,32], index: 1, kind: input, shape index: {}, may-alias: {0,1}]   ;;  %s2131_s2 = inlined_call_operand.vmem [shape: f32[1,32], index: 2, kind: input, shape index: {}, may-alias: {2,3}]   ;;  %s2132_s3 = inlined_call_operand.vmem [shape: f32[1,32], index: 3, kind: input, shape index: {}, may-alias: {2,3}]   ;;  %s2133_s4 = inlined_call_operand.vmem [shape: f32[32,32], index: 4, kind: input, shape index: {}]   ;;  %s2134_s5 = inlined_call_operand.vmem [shape: f32[32,16], index: 5, kind: input, shape index: {}]   ;;  %s2135_s6 = inlined_call_operand.vmem [shape: f32[32,16], index: 6, kind: input, shape index: {}]   ;;  %s2136_s7 = inlined_call_operand.vmem [shape: f32[32,32], index: 7, kind: input, shape index: {}]   ;;  %s2137_s8 = inlined_call_operand.vmem [shape: f32[8,32], index: 8, kind: input, shape index: {}]   ;;  %s2138_s9 = inlined_call_operand.vmem [shape: f32[8,32], index: 9, kind: input, shape index: {}]   ;;  %s2139_s10 = inlined_call_operand.vmem [shape: f32[32,32], index: 10, kind: input, shape index: {}]   ;;  %s2140_s11 = inlined_call_operand.vmem [shape: f32[2,8,32], index: 11, kind: output, shape index: {}]  }
   0x1 LB: > { %s1637_s18 = sadd.s32 4294967295, %s1855_s17   ;;  %p1641_p0 = scmp.ge.s32.totalorder %s1855_s17, 1  ;;  %s1855_s17 = sphi %s1925_s17, %s21_s17  }
   0x2   : > { %p345_p1 = scmp.lt.s32.totalorder %s1855_s17, 3 }
   0x4   : > { %p346_p2 = pnand %p1641_p0, %p345_p1 }
   0x5   : > { %p387_p3 = scmp.lt.s32.totalorder (!%p346_p2), %s1637_s18, 1  ;;  %s1859_s13 = smov (!%p346_p2), 112  }
   0x6   : > { %349 = sbr.rel (%p346_p2) target bundleno = 1707 (0x6ab), region = 64  ;;  %s1860_s14 = smov (!%p346_p2), 120  }
   0x7   : > { %s1861_s15 = smov (!%p346_p2), 104   ;;  %s1862_s26 = smov (!%p346_p2), 8  }
   0x8   : > { %s1863_s27 = smov (!%p346_p2), 16   ;;  %s1864_s28 = smov (!%p346_p2), 24  }
   0xb   : > { %s2142_s18 = smov (!%p387_p3, %s1637_s18), 1  ;;  %vm403_vm0 = vcmask 261120   ;;  %v438_v6 = vld [vmem:[%s2133_s4 + $0x18] sm:$0xff]  ;;  %v1857_v7 = vmov 0.0   ;;  %v437_v8 = vld [vmem:[%s2133_s4 + $0x10] sm:$0xff]  ;;  %v436_v11 = vld [vmem:[%s2133_s4 + $0x8] sm:$0xff]  ;;  %v822_v59 = vlaneseq }
   0xc   : > { %s1933_s19 = sshll.u32 %s2142_s18, 3  ;;  %1711 = vmatprep.subr.mxu0 %v1857_v7  ;;  %1722 = vmatprep.subr.mxu1 %v1857_v7  ;;  %v515_v9 = vld [vmem:[%s2134_s5 + $0x18] sm:$0xff]  ;;  %v514_v10 = vld [vmem:[%s2134_s5 + $0x10] sm:$0xff]  ;;  %vm1858_vm1 = vmmov 0   ;;  %v435_v12 = vld [vmem:[%s2133_s4] sm:$0xff]  ;;  %vm746_vm2 = vcmask 130048  }
   0xd   : > { %s390_s22 = scalar_lea.vmem %s2129_s0, %s1933_s19  ;;  %s394_s25 = scalar_lea.vmem %s2130_s1, %s1933_s19  ;;  %1712 = vmatpush3.msra.mxu0 %v438_v6  ;;  %1723 = vmatpush3.msra.mxu1 %v515_v9  ;;  %v513_v13 = vld [vmem:[%s2134_s5 + $0x8] sm:$0xff]  ;;  %v512_v14 = vld [vmem:[%s2134_s5] sm:$0xff]  ;;  %v592_v25 = vld [vmem:[%s2135_s6 + $0x18] sm:$0xff]  ;;  %vm827_vm3 = vcmask 64512   ;;  %v823_v60 = vshrl.u32 %v822_v59, 7  ;;  %v825_v61 = vand.u32 127, %v822_v59 }
   0xe   : > { %v1943_v0 = vld [vmem:[%s390_s22] sm:$0xff]  ;;  %1713 = vmatprep.subr.mxu0 %v1857_v7  ;;  %1724 = vmatprep.subr.mxu1 %v1857_v7  ;;  %v591_v28 = vld [vmem:[%s2135_s6 + $0x10] sm:$0xff]  ;;  %v590_v31 = vld [vmem:[%s2135_s6 + $0x8] sm:$0xff]  ;;  %vm1492_vm5 = vcmask 195584   ;;  %s398_s12 = scalar_lea.vmem %s2140_s11, %s1933_s19 }
   0xf   : > { %v400_v1 = vld [vmem:[%s394_s25] sm:$0xff]  ;;  %v402_v2 = vmul.f32 %v1943_v0, %v1943_v0  ;;  %1714 = vmatpush3.msra.mxu0 %v437_v8  ;;  %1719 = vmatprep.mubr.msk.f32.mxu0 %vm1858_vm1, %v1857_v7  ;;  %v668_v32 = vld [vmem:[%s2139_s10 + $0x18] sm:$0xff]  ;;  %v667_v34 = vld [vmem:[%s2139_s10 + $0x10] sm:$0xff]  ;;  %vm826_vm4 = vcmp.le.s32.totalorder %v825_v61, %v823_v60 }
  0x10   : > { %v420_v3 = vmul.f32 %v400_v1, %v400_v1  ;;  %1715 = vmatprep.subr.mxu0 %v1857_v7  ;;  %1725 = vmatpush3.msra.mxu1 %v514_v10  ;;  %v1645_v22 = vld [vmem:[%s2131_s2] ss:$0 sm:$0xff]  ;;  %v666_v35 = vld [vmem:[%s2139_s10 + $0x8] sm:$0xff] }
  0x11   : > { %v404_v4 = vsel %vm403_vm0, %v402_v2, 0.0  ;;  %1716 = vmatpush3.msra.mxu0 %v436_v11  ;;  %1726 = vmatprep.subr.mxu1 %v1857_v7  ;;  %v1646_v27 = vld [vmem:[%s2132_s3] ss:$0 sm:$0xff] }
  0x12   : > { %405 = vadd.xlane.f32.xlu0 %v404_v4  ;;  %v421_v5 = vsel %vm403_vm0, %v420_v3, 0.0  ;;  %1717 = vmatprep.subr.mxu0 %v1857_v7  ;;  %v589_v33 = vld [vmem:[%s2135_s6] sm:$0xff] }
  0x13   : > { %1730 = vmatprep.mubr.msk.f32.mxu1 %vm1858_vm1, %v1857_v7  ;;  %1718 = vmatpush3.msra.mxu0 %v435_v12  ;;  %v665_v36 = vld [vmem:[%s2139_s10] sm:$0xff] }
  0x14   : > { %1733 = vmatprep.subr.mxu0 %v1857_v7  ;;  %1727 = vmatpush3.msra.mxu1 %v513_v13  ;;  %v663_v43 = vld [vmem:[%s2137_s8] sm:$0xff] }
  0x15   : > { %1728 = vmatprep.subr.mxu1 %v1857_v7  ;;  %v664_v44 = vld [vmem:[%s2138_s9] sm:$0xff] }
  0x16   : > { %422 = vadd.xlane.f32.xlu0 %v421_v5  ;;  %1729 = vmatpush3.msra.mxu1 %v512_v14 }
  0x17   : > { %1744 = vmatprep.subr.mxu1 %v1857_v7 }
  0x9b   : > { %v406_v15 = vpop.xlane.xlu0 %405 }
  0x9c   : > { %v408_v16 = vmul.f32 0.03125, %v406_v15 }
  0x9e   : > { %v409_v17 = vadd.f32 1e-05, %v408_v16 }
  0x9f   : > { %v423_v18 = vpop.xlane.xlu0 %422 }
  0xa0   : > { %1829 = vrsqrt.f32 %v409_v17  ;;  %v424_v19 = vmul.f32 0.03125, %v423_v18 }
  0xa2   : > { %v425_v20 = vadd.f32 1e-05, %v424_v19 }
  0xa4   : > { %1831 = vrsqrt.f32 %v425_v20 }
  0xad   : > { %v1830_v21 = vpop.eup %1829 }
  0xae   : > { %v411_v23 = vmul.f32 %v1830_v21, %v1943_v0 }
  0xb0   : > { %v418_v24 = vmul.f32 %v1645_v22, %v411_v23 }
  0xb1   : > { %v1832_v26 = vpop.eup %1831 }
  0xb2   : > { %1720 = vmatmul.mubr.msk.f32.vlgmr.msra.gmra.mxu0 %vm403_vm0, %v418_v24  ;;  %v427_v29 = vmul.f32 %v1832_v26, %v400_v1 }
  0xb3   : > { %1734 = vmatpush3.msra.mxu0 %v592_v25  ;;  %1741 = vmatprep.mubr.msk.f32.mxu0 %vm1858_vm1, %v1857_v7 }
  0xb4   : > { %1735 = vmatprep.subr.mxu0 %v1857_v7  ;;  %v434_v30 = vmul.f32 %v1646_v27, %v427_v29 }
  0xb5   : > { %1736 = vmatpush3.msra.mxu0 %v591_v28 }
  0xb6   : > { %1737 = vmatprep.subr.mxu0 %v1857_v7  ;;  %1731 = vmatmul.mubr.msk.f32.vlgmr.msra.gmra.mxu1 %vm403_vm0, %v434_v30 }
  0xb7   : > { %1738 = vmatpush3.msra.mxu0 %v590_v31  ;;  %1745 = vmatpush3.msra.mxu1 %v668_v32 }
  0xb8   : > { %1739 = vmatprep.subr.mxu0 %v1857_v7  ;;  %1746 = vmatprep.subr.mxu1 %v1857_v7 }
  0xb9   : > { %1740 = vmatpush3.msra.mxu0 %v589_v33  ;;  %1747 = vmatpush3.msra.mxu1 %v667_v34 }
  0xba   : > { %1742 = vmatmul.mubr.msk.f32.vlgmr.msra.gmra.mxu0 %vm403_vm0, %v434_v30  ;;  %1748 = vmatprep.subr.mxu1 %v1857_v7 }
  0xbb   : > { %1749 = vmatpush3.msra.mxu1 %v666_v35  ;;  %1752 = vmatprep.mubr.msk.f32.mxu1 %vm1858_vm1, %v1857_v7 }
  0xbc   : > { %1750 = vmatprep.subr.mxu1 %v1857_v7  ;;  %1755 = vmatprep.subr.mxu0 %v1857_v7 }
  0xbd   : > { %1756 = vmatpush3.msra.mxu0 %v666_v35  ;;  %1759 = vmatprep.mubr.msk.f32.mxu0 %vm1858_vm1, %v1857_v7 }
  0xbe   : > { %1757 = vmatprep.subr.mxu0 %v1857_v7  ;;  %1751 = vmatpush3.msra.mxu1 %v665_v36 }
  0xbf   : > { %1758 = vmatpush3.msra.mxu0 %v665_v36  ;;  %1762 = vmatprep.subr.mxu1 %v1857_v7 }
  0xc0   : > { %1767 = vmatprep.subr.mxu0 %v1857_v7 }
 0x172   : > { %v508_v37 = vpop.f32.mrf.mxu0 }
 0x173   : > { %1753 = vmatmul.mubr.msk.f32.vlgmr.msra.gmra.mxu1 %vm403_vm0, %v508_v37  ;;  %v669_v46 = vmul.f32 %v663_v43, %v508_v37 }
 0x174   : > { %v1721_v38 = vpop.f32.mrf.mxu0  ;;  %1764 = vmatprep.mubr.msk.f32.mxu1 %vm1858_vm1, %v1857_v7 }
 0x176   : > { %v585_v39 = vpop.f32.mrf.mxu1 }
 0x177   : > { %1760 = vmatmul.mubr.msk.f32.vlgmr.msra.gmra.mxu0 %vm746_vm2, %v585_v39  ;;  %v745_v51 = vmul.f32 %v663_v43, %v585_v39 }
 0x178   : > { %v1732_v40 = vpop.f32.mrf.mxu1  ;;  %1769 = vmatprep.mubr.msk.f32.mxu0 %vm1858_vm1, %v1857_v7 }
 0x17a   : > { %v2043_v41 = vpop.f32.mrf.mxu0 }
 0x17b   : > { %1768 = vmatpush3.msra.mxu0 %v2043_v41 }
 0x17c   : > { %v1743_v42 = vpop.f32.mrf.mxu0  ;;  %1777 = vmatprep.subr.mxu0 %v1857_v7 }
 0x233   : > { %v739_v45 = vpop.f32.mrf.mxu1 }
 0x234   : > { %v743_v47 = vmul.f32 %v739_v45, %v664_v44 }
 0x235   : > { %v1754_v48 = vpop.f32.mrf.mxu1 }
 0x236   : > { %v744_v49 = vadd.f32 %v743_v47, %v669_v46 }
 0x237   : > { %v816_v50 = vpop.f32.mrf.mxu0 }
 0x238   : > { %v820_v52 = vmul.f32 %v816_v50, %v664_v44  ;;  %1150 = vrot.lane.b32.xlu0 %v744_v49, %s1859_s13  ;;  %990 = vrot.lane.b32.xlu1 %v744_v49, %s1860_s14 }
 0x239   : > { %v1761_v53 = vpop.f32.mrf.mxu0 }
 0x23a   : > { %v821_v54 = vadd.f32 %v820_v52, %v745_v51 }
 0x23c   : > { %1763 = vmatpush3.xpose.msk.msra.mxu1 %vm827_vm3, %v821_v54  ;;  %1152 = vrot.lane.b32.xlu1 %v821_v54, %s1860_s14 }
 0x23d   : > { %1772 = vmatprep.subr.mxu1 %v1857_v7 }
 0x23f   : > { %1765 = vmatmul.mubr.msk.f32.vlgmr.msra.gmra.mxu1 %vm827_vm3, %v744_v49 }
 0x240   : > { %1318 = vrot.lane.b32.xlu1 %v744_v49, %s1861_s15  ;;  %1773 = vmatpush3.xpose.msk.msra.mxu1 %vm827_vm3, %v821_v54 }
 0x241   : > { %1774 = vmatprep.mubr.msk.f32.mxu1 %vm1858_vm1, %v1857_v7  ;;  %1782 = vmatprep.subr.mxu1 %v1857_v7 }
 0x2aa   : > { %v991_v55 = vpop.permute.xlu1 %990  ;;  %v1151_v57 = vpop.permute.xlu0 %1150 }
 0x2ab   : > { %1775 = vmatmul.mubr.msk.f32.vlgmr.msra.gmra.mxu1 %vm827_vm3, %v991_v55  ;;  %v1497_v55 = vld [vmem:[%s2136_s7 + $0x18] sm:$0xff] }
 0x2ac   : > { %1784 = vmatprep.mubr.msk.f32.mxu1 %vm1858_vm1, %v1857_v7 }
 0x2ae   : > { %v1153_v56 = vpop.permute.xlu1 %1152 }
 0x2af   : > { %1783 = vmatpush3.xpose.msk.msra.mxu1 %vm827_vm3, %v1153_v56 }
 0x2b0   : > { %1792 = vmatprep.subr.mxu1 %v1857_v7 }
 0x2b2   : > { %1785 = vmatmul.mubr.msk.f32.vlgmr.msra.gmra.mxu1 %vm827_vm3, %v1151_v57  ;;  %v1319_v58 = vpop.permute.xlu1 %1318  ;;  %v1495_v57 = vld [vmem:[%s2136_s7 + $0x8] sm:$0xff] }
 0x2b3   : > { %1793 = vmatpush3.xpose.msk.msra.mxu1 %vm827_vm3, %v1153_v56  ;;  %1794 = vmatprep.mubr.msk.f32.mxu1 %vm1858_vm1, %v1857_v7  ;;  %v1496_v56 = vld [vmem:[%s2136_s7 + $0x10] sm:$0xff] }
 0x2b4   : > { %1802 = vmatprep.subr.mxu1 %v1857_v7 }
 0x2b6   : > { %1795 = vmatmul.mubr.msk.f32.vlgmr.msra.gmra.mxu1 %vm827_vm3, %v1319_v58  ;;  %v1494_v58 = vld [vmem:[%s2136_s7] sm:$0xff] }
 0x2b7   : > { %1810 = vmatprep.mubr.msk.f32.mxu1 %vm1858_vm1, %v1857_v7  ;;  %1803 = vmatpush3.msra.mxu1 %v1497_v55 }
 0x2b8   : > { %1804 = vmatprep.subr.mxu1 %v1857_v7 }
 0x2b9   : > { %1805 = vmatpush3.msra.mxu1 %v1496_v56 }
 0x2ba   : > { %1806 = vmatprep.subr.mxu1 %v1857_v7 }
 0x2bb   : > { %1807 = vmatpush3.msra.mxu1 %v1495_v57 }
 0x2bc   : > { %1808 = vmatprep.subr.mxu1 %v1857_v7 }
 0x2bd   : > { %1809 = vmatpush3.msra.mxu1 %v1494_v58 }
 0x2ff   : > { %v900_v62 = vpop.f32.mrf.mxu1 }
 0x300   : > { %v904_v63 = vmul.f32 0.35355338, %v900_v62 }
 0x301   : > { %v1766_v1 = vpop.f32.mrf.mxu1 }
 0x302   : > { %v905_v2 = vsel %vm826_vm4, %v904_v63, -1e+30 }
 0x303   : > { %v906_v3 = vsel %vm827_vm3, %v905_v2, -inf }
 0x304   : > { %907 = vmax.xlane.f32.xlu1 %v906_v3 }
 0x36b   : > { %v1060_v4 = vpop.f32.mrf.mxu1 }
 0x36c   : > { %v1064_v5 = vmul.f32 0.35355338, %v1060_v4 }
 0x36d   : > { %v1776_v6 = vpop.f32.mrf.mxu1 }
 0x36e   : > { %v1065_v8 = vsel %vm826_vm4, %v1064_v5, -1e+30 }
 0x36f   : > { %v1066_v9 = vsel %vm827_vm3, %v1065_v8, -inf }
 0x370   : > { %1067 = vmax.xlane.f32.xlu0 %v1066_v9 }
 0x372   : > { %v1224_v10 = vpop.f32.mrf.mxu1 }
 0x373   : > { %v1228_v11 = vmul.f32 0.35355338, %v1224_v10 }
 0x374   : > { %v1786_v12 = vpop.f32.mrf.mxu1 }
 0x375   : > { %v1229_v13 = vsel %vm826_vm4, %v1228_v11, -1e+30 }
 0x376   : > { %v1388_v14 = vpop.f32.mrf.mxu1  ;;  %v1230_v15 = vsel %vm827_vm3, %v1229_v13, -inf }
 0x377   : > { %v1392_v16 = vmul.f32 0.35355338, %v1388_v14  ;;  %1231 = vmax.xlane.f32.xlu1 %v1230_v15 }
 0x378   : > { %v1796_v17 = vpop.f32.mrf.mxu1 }
 0x379   : > { %v1393_v18 = vsel %vm826_vm4, %v1392_v16, -1e+30 }
 0x37a   : > { %v1394_v19 = vsel %vm827_vm3, %v1393_v18, -inf }
 0x37b   : > { %1395 = vmax.xlane.f32.xlu1 %v1394_v19 }
 0x38d   : > { %v908_v20 = vpop.xlane.xlu1 %907 }
 0x38e   : > { %v909_v21 = vsub.f32 %v905_v2, %v908_v20 }
 0x390   : > { %v910_v22 = vmul.f32 1.442695, %v909_v21 }
 0x392   : > { %1833 = vpow2.f32 %v910_v22 }
 0x39f   : > { %v1834_v23 = vpop.eup %1833 }
 0x3a0   : > { %v912_v24 = vsel %vm827_vm3, %v1834_v23, 0.0 }
 0x3a1   : > { %913 = vadd.xlane.f32.xlu1 %v912_v24 }
 0x3f9   : > { %v1068_v25 = vpop.xlane.xlu0 %1067 }
 0x3fa   : > { %v1069_v26 = vsub.f32 %v1065_v8, %v1068_v25 }
 0x3fc   : > { %v1070_v27 = vmul.f32 1.442695, %v1069_v26 }
 0x3fe   : > { %1835 = vpow2.f32 %v1070_v27 }
 0x400   : > { %v1232_v28 = vpop.xlane.xlu1 %1231 }
 0x401   : > { %v1233_v29 = vsub.f32 %v1229_v13, %v1232_v28 }
 0x403   : > { %v1234_v30 = vmul.f32 1.442695, %v1233_v29 }
 0x404   : > { %v1396_v31 = vpop.xlane.xlu1 %1395 }
 0x405   : > { %1837 = vpow2.f32 %v1234_v30  ;;  %v1397_v32 = vsub.f32 %v1393_v18, %v1396_v31 }
 0x407   : > { %v1398_v33 = vmul.f32 1.442695, %v1397_v32 }
 0x409   : > { %1839 = vpow2.f32 %v1398_v33 }
 0x40b   : > { %v1836_v34 = vpop.eup %1835 }
 0x40c   : > { %v1072_v35 = vsel %vm827_vm3, %v1836_v34, 0.0 }
 0x40d   : > { %1073 = vadd.xlane.f32.xlu1 %v1072_v35 }
 0x412   : > { %v1838_v36 = vpop.eup %1837 }
 0x413   : > { %v1236_v37 = vsel %vm827_vm3, %v1838_v36, 0.0 }
 0x414   : > { %1237 = vadd.xlane.f32.xlu0 %v1236_v37 }
 0x416   : > { %v1840_v38 = vpop.eup %1839 }
 0x417   : > { %v1400_v39 = vsel %vm827_vm3, %v1840_v38, 0.0 }
 0x418   : > { %1401 = vadd.xlane.f32.xlu1 %v1400_v39 }
 0x42a   : > { %1242 = vrot.lane.b32.xlu0 %v2043_v41, %s1860_s14  ;;  %v914_v40 = vpop.xlane.xlu1 %913 }
 0x42b   : > { %1841 = vrcp.f32 %v914_v40 }
 0x438   : > { %v1842_v42 = vpop.eup %1841 }
 0x439   : > { %v916_v43 = vmul.f32 %v1842_v42, %v1834_v23 }
 0x43b   : > { %1770 = vmatmul.mubr.msk.f32.vlgmr.msra.gmra.mxu0 %vm827_vm3, %v916_v43 }
 0x43c   : > { %1778 = vmatpush3.msra.mxu0 %v2043_v41  ;;  %1779 = vmatprep.mubr.msk.f32.mxu0 %vm1858_vm1, %v1857_v7 }
 0x43d   : > { %1787 = vmatprep.subr.mxu0 %v1857_v7 }
 0x496   : > { %v1074_v44 = vpop.xlane.xlu1 %1073 }
 0x497   : > { %1843 = vrcp.f32 %v1074_v44 }
 0x49d   : > { %v1238_v45 = vpop.xlane.xlu0 %1237 }
 0x49e   : > { %1845 = vrcp.f32 %v1238_v45 }
 0x4a1   : > { %v1402_v46 = vpop.xlane.xlu1 %1401  ;;  %v1243_v49 = vpop.permute.xlu0 %1242 }
 0x4a2   : > { %1847 = vrcp.f32 %v1402_v46 }
 0x4a4   : > { %v1844_v47 = vpop.eup %1843 }
 0x4a5   : > { %v1076_v48 = vmul.f32 %v1844_v47, %v1836_v34 }
 0x4a7   : > { %1780 = vmatmul.mubr.msk.f32.vlgmr.msra.gmra.mxu0 %vm827_vm3, %v1076_v48 }
 0x4a8   : > { %1788 = vmatpush3.msra.mxu0 %v1243_v49  ;;  %1789 = vmatprep.mubr.msk.f32.mxu0 %vm1858_vm1, %v1857_v7 }
 0x4a9   : > { %1797 = vmatprep.subr.mxu0 %v1857_v7 }
 0x4ab   : > { %v1846_v41 = vpop.eup %1845 }
 0x4ac   : > { %v1240_v50 = vmul.f32 %v1846_v41, %v1838_v36 }
 0x4ae   : > { %1790 = vmatmul.mubr.msk.f32.vlgmr.msra.gmra.mxu0 %vm827_vm3, %v1240_v50 }
 0x4af   : > { %v1848_v51 = vpop.eup %1847  ;;  %1798 = vmatpush3.msra.mxu0 %v1243_v49  ;;  %1799 = vmatprep.mubr.msk.f32.mxu0 %vm1858_vm1, %v1857_v7 }
 0x4b0   : > { %v1404_v52 = vmul.f32 %v1848_v51, %v1840_v38 }
 0x4b2   : > { %1800 = vmatmul.mubr.msk.f32.vlgmr.msra.gmra.mxu0 %vm827_vm3, %v1404_v52 }
 0x4fb   : > { %v986_v53 = vpop.f32.mrf.mxu0 }
 0x4fd   : > { %v1771_v54 = vpop.f32.mrf.mxu0 }
 0x567   : > { %v1146_v59 = vpop.f32.mrf.mxu0 }
 0x568   : > { %1479 = vrot.lane.b32.xlu1 %v1146_v59, %s1862_s26 }
 0x569   : > { %v1781_v60 = vpop.f32.mrf.mxu0 }
 0x56e   : > { %v1314_v61 = vpop.f32.mrf.mxu0 }
 0x56f   : > { %1483 = vrot.lane.b32.xlu1 %v1314_v61, %s1863_s27 }
 0x570   : > { %v1791_v62 = vpop.f32.mrf.mxu0 }
 0x572   : > { %v1474_v63 = vpop.f32.mrf.mxu0 }
 0x573   : > { %1487 = vrot.lane.b32.xlu0 %v1474_v63, %s1864_s28 }
 0x574   : > { %v1801_v1 = vpop.f32.mrf.mxu0 }
 0x5da   : > { %v1480_v2 = vpop.permute.xlu1 %1479 }
 0x5db   : > { %v1490_v3 = vsel %vm827_vm3, %v986_v53, %v1480_v2 }
 0x5e1   : > { %v1484_v7 = vpop.permute.xlu1 %1483 }
 0x5e2   : > { %v1491_v4 = vsel %vm746_vm2, %v1490_v3, %v1484_v7 }
 0x5e5   : > { %v1488_v5 = vpop.permute.xlu0 %1487 }
 0x5e6   : > { %v1493_v6 = vsel %vm1492_vm5, %v1491_v4, %v1488_v5 }
 0x5e7   : > { %1811 = vmatmul.mubr.msk.f32.vlgmr.msra.gmra.mxu1 %vm403_vm0, %v1493_v6 }
 0x6a7   : > { %v1567_v8 = vpop.f32.mrf.mxu1 }
 0x6a8   : > { %v1568_v9 = vadd.f32 %v1567_v8, %v1943_v0 }
 0x6a9   : > { %v1812_v10 = vpop.f32.mrf.mxu1 }
 0x6aa   : > { %1571 = vst.msk [vmem:[%s398_s12] sm:$0xff] %vm403_vm0, %v1568_v9 }
 0x6ab PF: > { %s21_s17 = sadd.s32 1, %s1855_s17  }
 0x6ac   : > { %p18_p4 = scmp.ge.s32.totalorder %s21_s17, 4  }
 0x6ae   :  { %20 = sbr.rel (!%p18_p4) target bundleno = 1 (0x1), region = 97 }

</bundles_post_ra>
